<compile_context>
chip_gen: v7x
topology: tpu7x:2x2x1
jax: 0.10.0
libtpu: 0.0.40
codegen_flags: <defaults>
</compile_context>

<pallas_src>
import jax
import jax.numpy as jnp
from jax.experimental import pallas as pl
from jax.experimental.pallas import tpu as pltpu

D_IN, D_H1, D_H2, D_OUT = 792, 1024, 256, 32


def _round_up(n, m):
    return ((n + m - 1) // m) * m


def mlp_kernel(x_ref, w1_ref, b1_ref, w2_ref, b2_ref, w3_ref, b3_ref, o_ref):
    # Layer 1: Linear(792 -> 1024) + ReLU   (bf16 MXU matmul, f32 accumulate, f32 epilogue)
    x = x_ref[...].astype(jnp.bfloat16)
    h1 = jnp.dot(x, w1_ref[...], preferred_element_type=jnp.float32)
    h1 = jnp.maximum(h1 + b1_ref[...], 0.0)

    # Layer 2: Linear(1024 -> 256) -> dropout (identity, eval mode) -> ReLU
    h2 = jnp.dot(h1.astype(jnp.bfloat16), w2_ref[...],
                 preferred_element_type=jnp.float32)
    h2 = jnp.maximum(h2 + b2_ref[...], 0.0)

    # Layer 3: Linear(256 -> 32) -> dropout (identity, eval mode) -> ReLU
    h3 = jnp.dot(h2.astype(jnp.bfloat16), w3_ref[...],
                 preferred_element_type=jnp.float32)
    h3 = jnp.maximum(h3 + b3_ref[...], 0.0)

    o_ref[...] = h3.astype(o_ref.dtype)


def b_k_model_forward(x, params, *, tile_b=256):
    """x: (B, 792) f32.  params: (w1, b1, w2, b2, w3, b3), weights (in, out), biases (1, out)."""
    w1, b1, w2, b2, w3, b3 = params
    B = x.shape[0]

    # Batch tile: multiple of 8 (sublane), capped at `tile_b` rows (fits comfortably in VMEM
    # on v7x's 64 MiB; v5e/v6e have 128 MiB so this is conservative there too).
    TB = min(tile_b, _round_up(B, 8))
    Bp = _round_up(B, TB)
    if Bp != B:
        x = jnp.pad(x, ((0, Bp - B), (0, 0)))
    grid = (Bp // TB,)

    # One-time weight cast to bf16 (halves weight HBM bytes; f32 accumulation in kernel).
    w1b = w1.astype(jnp.bfloat16)
    w2b = w2.astype(jnp.bfloat16)
    w3b = w3.astype(jnp.bfloat16)

    def resident(shape):
        # Whole-array block with a constant index_map -> loaded once, resident across grid steps.
        return pl.BlockSpec(shape, lambda i: tuple(0 for _ in shape))

    flops = 2 * Bp * (D_IN * D_H1 + D_H1 * D_H2 + D_H2 * D_OUT)
    bytes_accessed = (
        (D_IN * D_H1 + D_H1 * D_H2 + D_H2 * D_OUT) * 2      # bf16 weights
        + (D_H1 + D_H2 + D_OUT) * 4                         # f32 biases
        + Bp * D_IN * 4 + Bp * D_OUT * 4                    # x in, out
    )

    out = pl.pallas_call(
        mlp_kernel,
        out_shape=jax.ShapeDtypeStruct((Bp, D_OUT), jnp.float32),
        grid=grid,
        in_specs=[
            pl.BlockSpec((TB, D_IN), lambda i: (i, 0)),      # x: tiled along batch
            resident(w1b.shape), resident(b1.shape),
            resident(w2b.shape), resident(b2.shape),
            resident(w3b.shape), resident(b3.shape),
        ],
        out_specs=pl.BlockSpec((TB, D_OUT), lambda i: (i, 0)),
        compiler_params=pltpu.CompilerParams(
            dimension_semantics=("parallel",),               # megacore sharding on v7x
            vmem_limit_bytes=32 << 20,
        ),
        cost_estimate=pl.CostEstimate(
            flops=flops, transcendentals=0, bytes_accessed=bytes_accessed),
    )(x, w1b, b1, w2b, b2, w3b, b3)

    return out[:B] if Bp != B else out


def init_params(key):
    """Deterministic init mimicking nn.Linear default (U(-1/sqrt(fan_in), 1/sqrt(fan_in)))."""
    def linear(key, fan_in, fan_out):
        kw, kb = jax.random.split(key)
        bound = 1.0 / jnp.sqrt(fan_in)
        w = jax.random.uniform(kw, (fan_in, fan_out), jnp.float32, -bound, bound)
        b = jax.random.uniform(kb, (1, fan_out), jnp.float32, -bound, bound)
        return w, b

    k1, k2, k3 = jax.random.split(key, 3)
    w1, b1 = linear(k1, D_IN, D_H1)
    w2, b2 = linear(k2, D_H1, D_H2)
    w3, b3 = linear(k3, D_H2, D_OUT)
    return (w1, b1, w2, b2, w3, b3)


def reference_forward_f32(x, params):
    w1, b1, w2, b2, w3, b3 = params
    h1 = jnp.maximum(x @ w1 + b1, 0.0)
    h2 = jnp.maximum(h1 @ w2 + b2, 0.0)   # dropout = identity (eval)
    h3 = jnp.maximum(h2 @ w3 + b3, 0.0)   # dropout = identity (eval)
    return h3


if __name__ == "__main__":
    key = jax.random.PRNGKey(0)
    k_params, k_x1, k_x2 = jax.random.split(key, 3)

    params = init_params(k_params)

    # Case 1: small batch (single tile).
    x_small = jax.random.normal(k_x1, (8, D_IN), jnp.float32)
    out_small = jax.block_until_ready(b_k_model_forward(x_small, params))
    ref_small = reference_forward_f32(x_small, params)
    assert out_small.shape == (8, D_OUT), out_small.shape
    # bf16 weights -> looser tolerance vs the f32 reference.
    assert jnp.allclose(out_small, ref_small, atol=5e-2, rtol=5e-2), "mismatch (small batch)"

    # Case 2: batch > tile and not a multiple of the tile (exercises tiling + padding path).
    x_big = jax.random.normal(k_x2, (300, D_IN), jnp.float32)
    out_big = jax.block_until_ready(b_k_model_forward(x_big, params))
    ref_big = reference_forward_f32(x_big, params)
    assert out_big.shape == (300, D_OUT), out_big.shape
    assert jnp.allclose(out_big, ref_big, atol=5e-2, rtol=5e-2), "mismatch (tiled batch)"

    print("KERNEL_OK")
</pallas_src>

<mosaic_0001>
module attributes {stable_mosaic.version = 11 : i64} {
  func.func @mlp_kernel(%arg0: i32, %arg1: memref<8x792xf32, #tpu.memory_space<vmem>>, %arg2: memref<792x1024xbf16, #tpu.memory_space<vmem>>, %arg3: memref<1x1024xf32, #tpu.memory_space<vmem>>, %arg4: memref<1024x256xbf16, #tpu.memory_space<vmem>>, %arg5: memref<1x256xf32, #tpu.memory_space<vmem>>, %arg6: memref<256x32xbf16, #tpu.memory_space<vmem>>, %arg7: memref<1x32xf32, #tpu.memory_space<vmem>>, %arg8: memref<8x32xf32, #tpu.memory_space<vmem>>) attributes {dimension_semantics = [#tpu.dimension_semantics<parallel>], iteration_bounds = array<i64: 1>, scalar_prefetch = 0 : i64, scratch_operands = 0 : i64, tpu.core_type = #tpu.core_type<tc>, window_params = [{transform_indices = @transform_0, window_bounds = array<i64: 8, 792>}, {pipeline_mode = #tpu.pipeline_mode<synchronous>, transform_indices = @transform_1, window_bounds = array<i64: 792, 1024>}, {pipeline_mode = #tpu.pipeline_mode<synchronous>, transform_indices = @transform_2, window_bounds = array<i64: 1, 1024>}, {pipeline_mode = #tpu.pipeline_mode<synchronous>, transform_indices = @transform_3, window_bounds = array<i64: 1024, 256>}, {pipeline_mode = #tpu.pipeline_mode<synchronous>, transform_indices = @transform_4, window_bounds = array<i64: 1, 256>}, {pipeline_mode = #tpu.pipeline_mode<synchronous>, transform_indices = @transform_5, window_bounds = array<i64: 256, 32>}, {pipeline_mode = #tpu.pipeline_mode<synchronous>, transform_indices = @transform_6, window_bounds = array<i64: 1, 32>}, {transform_indices = @transform_7, window_bounds = array<i64: 8, 32>}]} {
    %c0 = arith.constant 0 : index
    %c0_0 = arith.constant 0 : index
    %0 = vector.load %arg1[%c0, %c0_0] : memref<8x792xf32, #tpu.memory_space<vmem>>, vector<8x792xf32>
    %1 = arith.truncf %0 : vector<8x792xf32> to vector<8x792xbf16>
    %c0_1 = arith.constant 0 : index
    %c0_2 = arith.constant 0 : index
    %2 = vector.load %arg2[%c0_1, %c0_2] : memref<792x1024xbf16, #tpu.memory_space<vmem>>, vector<792x1024xbf16>
    %cst = arith.constant dense<0.000000e+00> : vector<8x1024xf32>
    %3 = tpu.matmul %1, %2, %cst {dimension_numbers = #tpu.dot_dimension_numbers<[1], [0], [0], [1], [0, 0, 1, 1], [], []>} : vector<8x792xbf16>, vector<792x1024xbf16>, vector<8x1024xf32> -> vector<8x1024xf32>
    %c0_3 = arith.constant 0 : index
    %c0_4 = arith.constant 0 : index
    %4 = vector.load %arg3[%c0_3, %c0_4] : memref<1x1024xf32, #tpu.memory_space<vmem>>, vector<1x1024xf32>
    %5 = vector.broadcast %4 : vector<1x1024xf32> to vector<8x1024xf32>
    %6 = arith.addf %3, %5 : vector<8x1024xf32>
    %cst_5 = arith.constant 0.000000e+00 : f32
    %7 = vector.broadcast %cst_5 : f32 to vector<8x1024xf32>
    %8 = arith.maximumf %6, %7 : vector<8x1024xf32>
    %9 = arith.truncf %8 : vector<8x1024xf32> to vector<8x1024xbf16>
    %c0_6 = arith.constant 0 : index
    %c0_7 = arith.constant 0 : index
    %10 = vector.load %arg4[%c0_6, %c0_7] : memref<1024x256xbf16, #tpu.memory_space<vmem>>, vector<1024x256xbf16>
    %cst_8 = arith.constant dense<0.000000e+00> : vector<8x256xf32>
    %11 = tpu.matmul %9, %10, %cst_8 {dimension_numbers = #tpu.dot_dimension_numbers<[1], [0], [0], [1], [0, 0, 1, 1], [], []>} : vector<8x1024xbf16>, vector<1024x256xbf16>, vector<8x256xf32> -> vector<8x256xf32>
    %c0_9 = arith.constant 0 : index
    %c0_10 = arith.constant 0 : index
    %12 = vector.load %arg5[%c0_9, %c0_10] : memref<1x256xf32, #tpu.memory_space<vmem>>, vector<1x256xf32>
    %13 = vector.broadcast %12 : vector<1x256xf32> to vector<8x256xf32>
    %14 = arith.addf %11, %13 : vector<8x256xf32>
    %cst_11 = arith.constant 0.000000e+00 : f32
    %15 = vector.broadcast %cst_11 : f32 to vector<8x256xf32>
    %16 = arith.maximumf %14, %15 : vector<8x256xf32>
    %17 = arith.truncf %16 : vector<8x256xf32> to vector<8x256xbf16>
    %c0_12 = arith.constant 0 : index
    %c0_13 = arith.constant 0 : index
    %18 = vector.load %arg6[%c0_12, %c0_13] : memref<256x32xbf16, #tpu.memory_space<vmem>>, vector<256x32xbf16>
    %cst_14 = arith.constant dense<0.000000e+00> : vector<8x32xf32>
    %19 = tpu.matmul %17, %18, %cst_14 {dimension_numbers = #tpu.dot_dimension_numbers<[1], [0], [0], [1], [0, 0, 1, 1], [], []>} : vector<8x256xbf16>, vector<256x32xbf16>, vector<8x32xf32> -> vector<8x32xf32>
    %c0_15 = arith.constant 0 : index
    %c0_16 = arith.constant 0 : index
    %20 = vector.load %arg7[%c0_15, %c0_16] : memref<1x32xf32, #tpu.memory_space<vmem>>, vector<1x32xf32>
    %21 = vector.broadcast %20 : vector<1x32xf32> to vector<8x32xf32>
    %22 = arith.addf %19, %21 : vector<8x32xf32>
    %cst_17 = arith.constant 0.000000e+00 : f32
    %23 = vector.broadcast %cst_17 : f32 to vector<8x32xf32>
    %24 = arith.maximumf %22, %23 : vector<8x32xf32>
    %c0_18 = arith.constant 0 : index
    %c0_19 = arith.constant 0 : index
    %25 = vector.load %arg8[%c0_18, %c0_19] : memref<8x32xf32, #tpu.memory_space<vmem>>, vector<8x32xf32>
    tpu.vector_store %arg8[%c0_18, %c0_19], %24 {strides = array<i32>} : memref<8x32xf32, #tpu.memory_space<vmem>>, vector<8x32xf32>,
    return
  }
  func.func @transform_0(%arg0: i32) -> (i32, i32) {
    %c0_i32 = arith.constant 0 : i32
    %c0_i32_0 = arith.constant 0 : i32
    return %arg0, %c0_i32 : i32, i32
  }
  func.func @transform_1(%arg0: i32) -> (i32, i32) {
    %c0_i32 = arith.constant 0 : i32
    %c0_i32_0 = arith.constant 0 : i32
    %c0_i32_1 = arith.constant 0 : i32
    return %c0_i32, %c0_i32_0 : i32, i32
  }
  func.func @transform_2(%arg0: i32) -> (i32, i32) {
    %c0_i32 = arith.constant 0 : i32
    %c0_i32_0 = arith.constant 0 : i32
    %c0_i32_1 = arith.constant 0 : i32
    return %c0_i32, %c0_i32_0 : i32, i32
  }
  func.func @transform_3(%arg0: i32) -> (i32, i32) {
    %c0_i32 = arith.constant 0 : i32
    %c0_i32_0 = arith.constant 0 : i32
    %c0_i32_1 = arith.constant 0 : i32
    return %c0_i32, %c0_i32_0 : i32, i32
  }
  func.func @transform_4(%arg0: i32) -> (i32, i32) {
    %c0_i32 = arith.constant 0 : i32
    %c0_i32_0 = arith.constant 0 : i32
    %c0_i32_1 = arith.constant 0 : i32
    return %c0_i32, %c0_i32_0 : i32, i32
  }
  func.func @transform_5(%arg0: i32) -> (i32, i32) {
    %c0_i32 = arith.constant 0 : i32
    %c0_i32_0 = arith.constant 0 : i32
    %c0_i32_1 = arith.constant 0 : i32
    return %c0_i32, %c0_i32_0 : i32, i32
  }
  func.func @transform_6(%arg0: i32) -> (i32, i32) {
    %c0_i32 = arith.constant 0 : i32
    %c0_i32_0 = arith.constant 0 : i32
    %c0_i32_1 = arith.constant 0 : i32
    return %c0_i32, %c0_i32_0 : i32, i32
  }
  func.func @transform_7(%arg0: i32) -> (i32, i32) {
    %c0_i32 = arith.constant 0 : i32
    %c0_i32_0 = arith.constant 0 : i32
    return %arg0, %c0_i32 : i32, i32
  }
}

</mosaic_0001>

<bundles_post_ra>
// kernel: tpu_custom_call.1
= control target key start
LH: loop header
LB: loop body
LE: loop exit
PB: predicated region body
PF: predicated region fallthrough
CT: control target
= control target key end

     0   :  { %12 = vsyncpa [#allocation3], 0  ;;  %s5700_s0 = inlined_call_operand.hbm [shape: f32[8,792], index: 0, kind: input, shape index: {}]   ;;  %s5701_s1 = inlined_call_operand.hbm [shape: bf16[792,1024], index: 1, kind: input, shape index: {}]   ;;  %s5702_s2 = inlined_call_operand.hbm [shape: f32[1,1024], index: 2, kind: input, shape index: {}]   ;;  %s5703_s3 = inlined_call_operand.hbm [shape: bf16[1024,256], index: 3, kind: input, shape index: {}]   ;;  %s5704_s4 = inlined_call_operand.hbm [shape: f32[1,256], index: 4, kind: input, shape index: {}]   ;;  %s5705_s5 = inlined_call_operand.vmem [shape: bf16[256,32], index: 5, kind: input, shape index: {}]   ;;  %s5706_s6 = inlined_call_operand.hbm [shape: f32[1,32], index: 6, kind: input, shape index: {}]   ;;  %s5707_s7 = inlined_call_operand.hbm [shape: f32[8,32], index: 7, kind: output, shape index: {}]  }
   0x1   :  { %13 = vsyncpa [#allocation6], 0 }
   0x2   :  { %14 = vsyncpa [#allocation9], 0 }
   0x3   :  { %15 = vsyncpa [#allocation12], 0 }
   0x4   :  { %16 = vsyncpa [#allocation4], 0  ;;  %s5411_s24 = smov [#allocation5]   ;;  %s5247_s28 = scalar_lea.hbm %s5701_s1, 50688 }
   0x5   :  { %s32_s25 = sshll.u32 %s5411_s24, 4  ;;  %p5248_p0 = scmp.ne.s32.totalorder %s5701_s1, %s5247_s28  ;;  %s33_s25 = int_to_ptr.vmem [resolvable:$true] %s32_s25 }
   0x6   :  { %p5251_p1 = scmp.lt.u32.totalorder %s5247_s28, %s5701_s1 }
   0x8   :  { %p5253_p2 = pnand %p5251_p1, %p5248_p0 }
   0xa   :  { %5256 = shalt.err (!%p5253_p2)
}
   0xb   :  { %s5257_s10 = scalar_lea.vmem %s33_s25, 50688  ;;  %p5262_p4 = scmp.lt.s32.totalorder %s33_s25, %s33_s25 }
   0xc   :  { %p5258_p3 = scmp.ne.s32.totalorder %s33_s25, %s5257_s10  ;;  %p5263_p5 = scmp.lt.s32.totalorder %s5257_s10, %s5257_s10 }
   0xe   :  { %p5264_p6 = por %p5263_p5, %p5262_p4 }
  0x10   :  { %p5265_p7 = pnand %p5264_p6, %p5258_p3 }
  0x12   :  { %5268 = shalt.err (!%p5265_p7)
}
  0x13   :  { %s5412_s11 = smov 512   ;;  %s5413_s12 = smov 32  }
  0x14   :  { %38 = dma.hbm_to_vmem [thread:$0]  %s5701_s1, 50688, %s33_s25, [#allocation6], %s5412_s11, %s5412_s11, %s5413_s12  }
  0x15   :  { %s5414_s15 = smov [#allocation8]   ;;  %s5269_s19 = scalar_lea.hbm %s5703_s3, 16384 }
  0x16   :  { %s54_s16 = sshll.u32 %s5414_s15, 4  ;;  %p5270_p8 = scmp.ne.s32.totalorder %s5703_s3, %s5269_s19  ;;  %s55_s16 = int_to_ptr.vmem [resolvable:$true] %s54_s16 }
  0x17   :  { %p5273_p9 = scmp.lt.u32.totalorder %s5269_s19, %s5703_s3 }
  0x19   :  { %p5275_p10 = pnand %p5273_p9, %p5270_p8 }
  0x1b   :  { %5278 = shalt.err (!%p5275_p10)
}
  0x1c   :  { %s5279_s24 = scalar_lea.vmem %s55_s16, 16384  ;;  %p5284_p12 = scmp.lt.s32.totalorder %s55_s16, %s55_s16 }
  0x1d   :  { %p5280_p11 = scmp.ne.s32.totalorder %s55_s16, %s5279_s24  ;;  %p5285_p13 = scmp.lt.s32.totalorder %s5279_s24, %s5279_s24 }
  0x1f   :  { %p5286_p0 = por %p5285_p13, %p5284_p12 }
  0x21   :  { %p5287_p1 = pnand %p5286_p0, %p5280_p11 }
  0x23   :  { %5290 = shalt.err (!%p5287_p1)
}
  0x24   :  { %s5415_s1 = smov 128   ;;  %s5416_s25 = smov 8  }
  0x25   :  { %60 = dma.hbm_to_vmem [thread:$0]  %s5703_s3, 16384, %s55_s16, [#allocation9], %s5415_s1, %s5415_s1, %s5416_s25  }
  0x26   :  { %s5417_s28 = smov [#allocation2]   ;;  %s5418_s30 = smov [#allocation7]  }
  0x27   :  { %s23_s29 = sshll.u32 %s5417_s28, 4  ;;  %s45_s8 = sshll.u32 %s5418_s30, 4  ;;  %s24_s29 = int_to_ptr.vmem [resolvable:$true] %s23_s29  ;;  %s46_s8 = int_to_ptr.vmem [resolvable:$true] %s45_s8 }
  0x28   :  { %s5291_s11 = scalar_lea.hbm %s5700_s0, 896 }
  0x29   :  { %p5292_p2 = scmp.ne.s32.totalorder %s5700_s0, %s5291_s11  ;;  %p5295_p3 = scmp.lt.u32.totalorder %s5291_s11, %s5700_s0 }
  0x2b   :  { %p5297_p4 = pnand %p5295_p3, %p5292_p2 }
  0x2d   :  { %5300 = shalt.err (!%p5297_p4)
}
  0x2e   :  { %s5301_s3 = scalar_lea.vmem %s24_s29, 896  ;;  %p5306_p6 = scmp.lt.s32.totalorder %s24_s29, %s24_s29 }
  0x2f   :  { %p5302_p5 = scmp.ne.s32.totalorder %s24_s29, %s5301_s3  ;;  %p5307_p7 = scmp.lt.s32.totalorder %s5301_s3, %s5301_s3 }
  0x31   :  { %p5308_p8 = por %p5307_p7, %p5306_p6 }
  0x33   :  { %p5309_p9 = pnand %p5308_p8, %p5302_p5 }
  0x35   :  { %5312 = shalt.err (!%p5309_p9)
}
  0x36   :  { %26 = dma.hbm_to_vmem [thread:$0]  %s5700_s0, 896, %s24_s29, [#allocation3]  }
  0x37   :  { %s5313_s20 = scalar_lea.hbm %s5702_s2, 128 }
  0x38   :  { %p5314_p10 = scmp.ne.s32.totalorder %s5702_s2, %s5313_s20  ;;  %p5317_p11 = scmp.lt.u32.totalorder %s5313_s20, %s5702_s2 }
  0x3a   :  { %p5319_p12 = pnand %p5317_p11, %p5314_p10 }
  0x3c   :  { %5322 = shalt.err (!%p5319_p12)
}
  0x3d   :  { %s5323_s1 = scalar_lea.vmem %s46_s8, 128  ;;  %p5328_p0 = scmp.lt.s32.totalorder %s46_s8, %s46_s8 }
  0x3e   :  { %p5324_p13 = scmp.ne.s32.totalorder %s46_s8, %s5323_s1  ;;  %p5329_p1 = scmp.lt.s32.totalorder %s5323_s1, %s5323_s1 }
  0x40   :  { %p5330_p2 = por %p5329_p1, %p5328_p0 }
  0x42   :  { %p5331_p3 = pnand %p5330_p2, %p5324_p13 }
  0x44   :  { %5334 = shalt.err (!%p5331_p3)
}
  0x45   :  { %48 = dma.hbm_to_vmem [thread:$0]  %s5702_s2, 128, %s46_s8, [#allocation6]  }
  0x46   :  { %s5419_s26 = smov [#allocation10]   ;;  %s5420_s28 = smov [#allocation11]  }
  0x47   :  { %s67_s27 = sshll.u32 %s5419_s26, 4  ;;  %s79_s29 = sshll.u32 %s5420_s28, 4  ;;  %s68_s27 = int_to_ptr.vmem [resolvable:$true] %s67_s27  ;;  %s80_s29 = int_to_ptr.vmem [resolvable:$true] %s79_s29 }
  0x48   :  { %s5335_s10 = scalar_lea.hbm %s5704_s4, 32 }
  0x49   :  { %p5336_p4 = scmp.ne.s32.totalorder %s5704_s4, %s5335_s10  ;;  %p5339_p5 = scmp.lt.u32.totalorder %s5335_s10, %s5704_s4 }
  0x4b   :  { %p5341_p6 = pnand %p5339_p5, %p5336_p4 }
  0x4d   :  { %5344 = shalt.err (!%p5341_p6)
}
  0x4e   :  { %s5345_s2 = scalar_lea.vmem %s68_s27, 32  ;;  %p5350_p8 = scmp.lt.s32.totalorder %s68_s27, %s68_s27 }
  0x4f   :  { %p5346_p7 = scmp.ne.s32.totalorder %s68_s27, %s5345_s2  ;;  %p5351_p9 = scmp.lt.s32.totalorder %s5345_s2, %s5345_s2 }
  0x51   :  { %p5352_p10 = por %p5351_p9, %p5350_p8 }
  0x53   :  { %p5353_p11 = pnand %p5352_p10, %p5346_p7 }
  0x55   :  { %5356 = shalt.err (!%p5353_p11)
}
  0x56   :  { %70 = dma.hbm_to_vmem [thread:$0]  %s5704_s4, 32, %s68_s27, [#allocation9]  }
  0x57   :  { %s5357_s17 = scalar_lea.hbm %s5706_s6, 16 }
  0x58   :  { %p5358_p12 = scmp.ne.s32.totalorder %s5706_s6, %s5357_s17  ;;  %p5361_p13 = scmp.lt.u32.totalorder %s5357_s17, %s5706_s6 }
  0x5a   :  { %p5363_p0 = pnand %p5361_p13, %p5358_p12 }
  0x5c   :  { %5366 = shalt.err (!%p5363_p0)
}
  0x5d   :  { %s5367_s22 = scalar_lea.vmem %s80_s29, 16  ;;  %s5371_s23 = scalar_lea.vmem %s80_s29, 32 }
  0x5e   :  { %p5368_p1 = scmp.ne.s32.totalorder %s80_s29, %s5367_s22  ;;  %p5372_p2 = scmp.lt.s32.totalorder %s80_s29, %s80_s29 }
  0x5f   :  { %p5373_p3 = scmp.lt.s32.totalorder %s5371_s23, %s5367_s22 }
  0x61   :  { %p5374_p4 = por %p5373_p3, %p5372_p2 }
  0x63   :  { %p5375_p5 = pnand %p5374_p4, %p5368_p1 }
  0x65   :  { %5378 = shalt.err (!%p5375_p5)
}
  0x66   :  { %82 = dma.hbm_to_vmem [thread:$0]  %s5706_s6, 16, %s80_s29, [#allocation12]  }
  0x67   :  { %5401 = dma.done.wait [#allocation3], 896  }
  0x68   :  { %5402 = vsyncadd [#allocation3], 4294966400 }
  0x69   :  { %5403 = dma.done.wait [#allocation6], 50816  }
  0x6a   :  { %5404 = vsyncadd [#allocation6], 4294916480 }
  0x6b   :  { %5405 = dma.done.wait [#allocation9], 16416  }
  0x6c   :  { %5406 = vsyncadd [#allocation9], 4294950880 }
  0x6d   :  { %5407 = dma.done.wait [#allocation12], 16  }
  0x6e   :  { %5408 = vsyncadd [#allocation12], 4294967280  ;;  %v116_v0 = vld [vmem:[#allocation5] sm:$0xff]  ;;  %v107_v53 = vld [vmem:[#allocation2 + $0x28] sm:$0xff]  ;;  %vm2538_vm0 = vcmask 1043456   ;;  %vm2534_vm1 = vcmask 195584  }
  0x6f   :  { %v120_v1 = vld [vmem:[#allocation5 + $0x20] sm:$0xff]  ;;  %v103_v54 = vld [vmem:[#allocation2 + $0x8] sm:$0xff]  ;;  %v5535_v58 = vpack.c.bf16 %v107_v53, %v107_v53  ;;  %vm4359_vm2 = vcmask 261120  }
  0x70   :  { %v372_v2 = vld [vmem:[#allocation5 + $0x800] sm:$0xff]  ;;  %v4380_v3 = vcombine.high %v116_v0, %v120_v1  ;;  %v4379_v5 = vcombine.low %v116_v0, %v120_v1  ;;  %v5537_v59 = vpack.c.bf16 %v103_v54, %v103_v54 }
  0x71   :  { %v376_v4 = vld [vmem:[#allocation5 + $0x820] sm:$0xff]  ;;  %2677 = vmatprep.mubr.bf16.mxu0 %v5535_v58 }
  0x72   :  { %v124_v6 = vld [vmem:[#allocation5 + $0x40] sm:$0xff]  ;;  %v4636_v8 = vcombine.high %v372_v2, %v376_v4  ;;  %v4635_v9 = vcombine.low %v372_v2, %v376_v4  ;;  %2563 = vmatprep.subr.bf16.mxu1 %v4380_v3  ;;  %2595 = vmatprep.mubr.bf16.mxu1 %v5537_v59 }
  0x73   :  { %v128_v7 = vld [vmem:[#allocation5 + $0x60] sm:$0xff]  ;;  %2564 = vmatpush1.bf16.msra.mxu1 %v4379_v5 }
  0x74   :  { %v4388_v10 = vcombine.high %v124_v6, %v128_v7  ;;  %v380_v11 = vld [vmem:[#allocation5 + $0x840] sm:$0xff]  ;;  %2645 = vmatprep.subr.bf16.mxu0 %v4636_v8  ;;  %v4387_v18 = vcombine.low %v124_v6, %v128_v7 }
  0x75   :  { %v384_v12 = vld [vmem:[#allocation5 + $0x860] sm:$0xff]  ;;  %2646 = vmatpush1.bf16.msra.mxu0 %v4635_v9 }
  0x76   :  { %v132_v13 = vld [vmem:[#allocation5 + $0x80] sm:$0xff]  ;;  %v4644_v14 = vcombine.high %v380_v11, %v384_v12  ;;  %2565 = vmatprep.subr.bf16.mxu1 %v4388_v10  ;;  %v4643_v19 = vcombine.low %v380_v11, %v384_v12 }
  0x77   :  { %v136_v15 = vld [vmem:[#allocation5 + $0xa0] sm:$0xff]  ;;  %2566 = vmatpush1.bf16.msra.mxu1 %v4387_v18 }
  0x78   :  { %v388_v16 = vld [vmem:[#allocation5 + $0x880] sm:$0xff]  ;;  %v4396_v20 = vcombine.high %v132_v13, %v136_v15  ;;  %2647 = vmatprep.subr.bf16.mxu0 %v4644_v14  ;;  %v4395_v26 = vcombine.low %v132_v13, %v136_v15 }
  0x79   :  { %v392_v17 = vld [vmem:[#allocation5 + $0x8a0] sm:$0xff]  ;;  %2648 = vmatpush1.bf16.msra.mxu0 %v4643_v19 }
  0x7a   :  { %v4652_v21 = vcombine.high %v388_v16, %v392_v17  ;;  %v140_v22 = vld [vmem:[#allocation5 + $0xc0] sm:$0xff]  ;;  %2567 = vmatprep.subr.bf16.mxu1 %v4396_v20  ;;  %v4651_v27 = vcombine.low %v388_v16, %v392_v17 }
  0x7b   :  { %v144_v23 = vld [vmem:[#allocation5 + $0xe0] sm:$0xff]  ;;  %2568 = vmatpush1.bf16.msra.mxu1 %v4395_v26 }
  0x7c   :  { %v396_v24 = vld [vmem:[#allocation5 + $0x8c0] sm:$0xff]  ;;  %v4404_v28 = vcombine.high %v140_v22, %v144_v23  ;;  %2649 = vmatprep.subr.bf16.mxu0 %v4652_v21  ;;  %v4403_v34 = vcombine.low %v140_v22, %v144_v23 }
  0x7d   :  { %v400_v25 = vld [vmem:[#allocation5 + $0x8e0] sm:$0xff]  ;;  %2650 = vmatpush1.bf16.msra.mxu0 %v4651_v27 }
  0x7e   :  { %v4660_v29 = vcombine.high %v396_v24, %v400_v25  ;;  %v148_v30 = vld [vmem:[#allocation5 + $0x100] sm:$0xff]  ;;  %2569 = vmatprep.subr.bf16.mxu1 %v4404_v28  ;;  %v4659_v35 = vcombine.low %v396_v24, %v400_v25 }
  0x7f   :  { %v152_v31 = vld [vmem:[#allocation5 + $0x120] sm:$0xff]  ;;  %2570 = vmatpush1.bf16.msra.mxu1 %v4403_v34 }
  0x80   :  { %v404_v32 = vld [vmem:[#allocation5 + $0x900] sm:$0xff]  ;;  %v4412_v36 = vcombine.high %v148_v30, %v152_v31  ;;  %2651 = vmatprep.subr.bf16.mxu0 %v4660_v29  ;;  %v4411_v42 = vcombine.low %v148_v30, %v152_v31 }
  0x81   :  { %v408_v33 = vld [vmem:[#allocation5 + $0x920] sm:$0xff]  ;;  %2652 = vmatpush1.bf16.msra.mxu0 %v4659_v35 }
  0x82   :  { %v4668_v37 = vcombine.high %v404_v32, %v408_v33  ;;  %v156_v38 = vld [vmem:[#allocation5 + $0x140] sm:$0xff]  ;;  %2571 = vmatprep.subr.bf16.mxu1 %v4412_v36  ;;  %v4667_v43 = vcombine.low %v404_v32, %v408_v33 }
  0x83   :  { %v160_v39 = vld [vmem:[#allocation5 + $0x160] sm:$0xff]  ;;  %2572 = vmatpush1.bf16.msra.mxu1 %v4411_v42 }
  0x84   :  { %v412_v40 = vld [vmem:[#allocation5 + $0x940] sm:$0xff]  ;;  %v4420_v44 = vcombine.high %v156_v38, %v160_v39  ;;  %2653 = vmatprep.subr.bf16.mxu0 %v4668_v37  ;;  %v4419_v50 = vcombine.low %v156_v38, %v160_v39 }
  0x85   :  { %v416_v41 = vld [vmem:[#allocation5 + $0x960] sm:$0xff]  ;;  %2654 = vmatpush1.bf16.msra.mxu0 %v4667_v43 }
  0x86   :  { %v4676_v45 = vcombine.high %v412_v40, %v416_v41  ;;  %v164_v46 = vld [vmem:[#allocation5 + $0x180] sm:$0xff]  ;;  %2573 = vmatprep.subr.bf16.mxu1 %v4420_v44  ;;  %v4675_v51 = vcombine.low %v412_v40, %v416_v41 }
  0x87   :  { %v168_v47 = vld [vmem:[#allocation5 + $0x1a0] sm:$0xff]  ;;  %2574 = vmatpush1.bf16.msra.mxu1 %v4419_v50 }
  0x88   :  { %v420_v48 = vld [vmem:[#allocation5 + $0x980] sm:$0xff]  ;;  %v4428_v52 = vcombine.high %v164_v46, %v168_v47  ;;  %2655 = vmatprep.subr.bf16.mxu0 %v4676_v45  ;;  %v4427_v62 = vcombine.low %v164_v46, %v168_v47 }
  0x89   :  { %v424_v49 = vld [vmem:[#allocation5 + $0x9a0] sm:$0xff]  ;;  %2656 = vmatpush1.bf16.msra.mxu0 %v4675_v51 }
  0x8a   :  { %v4684_v55 = vcombine.high %v420_v48, %v424_v49  ;;  %v172_v56 = vld [vmem:[#allocation5 + $0x1c0] sm:$0xff]  ;;  %2575 = vmatprep.subr.bf16.mxu1 %v4428_v52  ;;  %v4683_v63 = vcombine.low %v420_v48, %v424_v49 }
  0x8b   :  { %v176_v57 = vld [vmem:[#allocation5 + $0x1e0] sm:$0xff]  ;;  %2576 = vmatpush1.bf16.msra.mxu1 %v4427_v62 }
  0x8c   :  { %v428_v60 = vld [vmem:[#allocation5 + $0x9c0] sm:$0xff]  ;;  %v4436_v0 = vcombine.high %v172_v56, %v176_v57  ;;  %2657 = vmatprep.subr.bf16.mxu0 %v4684_v55  ;;  %v4435_v6 = vcombine.low %v172_v56, %v176_v57 }
  0x8d   :  { %v432_v61 = vld [vmem:[#allocation5 + $0x9e0] sm:$0xff]  ;;  %2658 = vmatpush1.bf16.msra.mxu0 %v4683_v63 }
  0x8e   :  { %v4692_v1 = vcombine.high %v428_v60, %v432_v61  ;;  %v180_v2 = vld [vmem:[#allocation5 + $0x200] sm:$0xff]  ;;  %2577 = vmatprep.subr.bf16.mxu1 %v4436_v0  ;;  %v4691_v7 = vcombine.low %v428_v60, %v432_v61 }
  0x8f   :  { %v184_v3 = vld [vmem:[#allocation5 + $0x220] sm:$0xff]  ;;  %2578 = vmatpush1.bf16.msra.mxu1 %v4435_v6 }
  0x90   :  { %v436_v4 = vld [vmem:[#allocation5 + $0xa00] sm:$0xff]  ;;  %v4444_v8 = vcombine.high %v180_v2, %v184_v3  ;;  %2659 = vmatprep.subr.bf16.mxu0 %v4692_v1  ;;  %v4443_v14 = vcombine.low %v180_v2, %v184_v3 }
  0x91   :  { %v440_v5 = vld [vmem:[#allocation5 + $0xa20] sm:$0xff]  ;;  %2660 = vmatpush1.bf16.msra.mxu0 %v4691_v7 }
  0x92   :  { %v4700_v9 = vcombine.high %v436_v4, %v440_v5  ;;  %v188_v10 = vld [vmem:[#allocation5 + $0x240] sm:$0xff]  ;;  %2579 = vmatprep.subr.bf16.mxu1 %v4444_v8  ;;  %v4699_v15 = vcombine.low %v436_v4, %v440_v5 }
  0x93   :  { %v192_v11 = vld [vmem:[#allocation5 + $0x260] sm:$0xff]  ;;  %2580 = vmatpush1.bf16.msra.mxu1 %v4443_v14 }
  0x94   :  { %v444_v12 = vld [vmem:[#allocation5 + $0xa40] sm:$0xff]  ;;  %v4452_v16 = vcombine.high %v188_v10, %v192_v11  ;;  %2661 = vmatprep.subr.bf16.mxu0 %v4700_v9  ;;  %v4451_v22 = vcombine.low %v188_v10, %v192_v11  ;;  %v102_v9 = vld [vmem:[#allocation2] sm:$0xff] }
  0x95   :  { %v448_v13 = vld [vmem:[#allocation5 + $0xa60] sm:$0xff]  ;;  %2662 = vmatpush1.bf16.msra.mxu0 %v4699_v15 }
  0x96   :  { %v4708_v17 = vcombine.high %v444_v12, %v448_v13  ;;  %v196_v18 = vld [vmem:[#allocation5 + $0x280] sm:$0xff]  ;;  %2581 = vmatprep.subr.bf16.mxu1 %v4452_v16  ;;  %v4707_v23 = vcombine.low %v444_v12, %v448_v13  ;;  %v106_v12 = vld [vmem:[#allocation2 + $0x20] sm:$0xff]  ;;  %v5541_v16 = vpack.c.bf16 %v102_v9, %v102_v9 }
  0x97   :  { %v200_v19 = vld [vmem:[#allocation5 + $0x2a0] sm:$0xff]  ;;  %2582 = vmatpush1.bf16.msra.mxu1 %v4451_v22 }
  0x98   :  { %v452_v20 = vld [vmem:[#allocation5 + $0xa80] sm:$0xff]  ;;  %v4460_v24 = vcombine.high %v196_v18, %v200_v19  ;;  %2663 = vmatprep.subr.bf16.mxu0 %v4708_v17  ;;  %v4459_v30 = vcombine.low %v196_v18, %v200_v19  ;;  %v5543_v19 = vpack.c.bf16 %v106_v12, %v106_v12 }
  0x99   :  { %v456_v21 = vld [vmem:[#allocation5 + $0xaa0] sm:$0xff]  ;;  %2664 = vmatpush1.bf16.msra.mxu0 %v4707_v23 }
  0x9a   :  { %v4716_v25 = vcombine.high %v452_v20, %v456_v21  ;;  %v204_v26 = vld [vmem:[#allocation5 + $0x2c0] sm:$0xff]  ;;  %2583 = vmatprep.subr.bf16.mxu1 %v4460_v24  ;;  %v4715_v31 = vcombine.low %v452_v20, %v456_v21 }
  0x9b   :  { %v208_v27 = vld [vmem:[#allocation5 + $0x2e0] sm:$0xff]  ;;  %2584 = vmatpush1.bf16.msra.mxu1 %v4459_v30 }
  0x9c   :  { %v460_v28 = vld [vmem:[#allocation5 + $0xac0] sm:$0xff]  ;;  %v4468_v32 = vcombine.high %v204_v26, %v208_v27  ;;  %2665 = vmatprep.subr.bf16.mxu0 %v4716_v25  ;;  %v4467_v38 = vcombine.low %v204_v26, %v208_v27  ;;  %v501_v27 = vld [vmem:[#allocation5 + $0xc08] sm:$0xff] }
  0x9d   :  { %v464_v29 = vld [vmem:[#allocation5 + $0xae0] sm:$0xff]  ;;  %2666 = vmatpush1.bf16.msra.mxu0 %v4715_v31 }
  0x9e   :  { %v4724_v33 = vcombine.high %v460_v28, %v464_v29  ;;  %v212_v34 = vld [vmem:[#allocation5 + $0x300] sm:$0xff]  ;;  %2585 = vmatprep.subr.bf16.mxu1 %v4468_v32  ;;  %v4723_v39 = vcombine.low %v460_v28, %v464_v29  ;;  %v505_v28 = vld [vmem:[#allocation5 + $0xc28] sm:$0xff] }
  0x9f   :  { %v216_v35 = vld [vmem:[#allocation5 + $0x320] sm:$0xff]  ;;  %2586 = vmatpush1.bf16.msra.mxu1 %v4467_v38 }
  0xa0   :  { %v468_v36 = vld [vmem:[#allocation5 + $0xb00] sm:$0xff]  ;;  %v4476_v40 = vcombine.high %v212_v34, %v216_v35  ;;  %2667 = vmatprep.subr.bf16.mxu0 %v4724_v33  ;;  %v4475_v46 = vcombine.low %v212_v34, %v216_v35  ;;  %v5421_v33 = vmov 0   ;;  %v4766_v34 = vcombine.high %v501_v27, %v505_v28 }
  0xa1   :  { %v472_v37 = vld [vmem:[#allocation5 + $0xb20] sm:$0xff]  ;;  %2668 = vmatpush1.bf16.msra.mxu0 %v4723_v39  ;;  %v108_v39 = vld [vmem:[#allocation2 + $0x30] sm:$0xff] }
  0xa2   :  { %v4732_v41 = vcombine.high %v468_v36, %v472_v37  ;;  %v220_v42 = vld [vmem:[#allocation5 + $0x340] sm:$0xff]  ;;  %2587 = vmatprep.subr.bf16.mxu1 %v4476_v40  ;;  %v4731_v47 = vcombine.low %v468_v36, %v472_v37  ;;  %v509_v40 = vld [vmem:[#allocation5 + $0xc48] sm:$0xff] }
  0xa3   :  { %v224_v43 = vld [vmem:[#allocation5 + $0x360] sm:$0xff]  ;;  %2588 = vmatpush1.bf16.msra.mxu1 %v4475_v46 }
  0xa4   :  { %v476_v44 = vld [vmem:[#allocation5 + $0xb40] sm:$0xff]  ;;  %v4484_v48 = vcombine.high %v220_v42, %v224_v43  ;;  %2669 = vmatprep.subr.bf16.mxu0 %v4732_v41  ;;  %v4483_v54 = vcombine.low %v220_v42, %v224_v43 }
  0xa5   :  { %v480_v45 = vld [vmem:[#allocation5 + $0xb60] sm:$0xff]  ;;  %2670 = vmatpush1.bf16.msra.mxu0 %v4731_v47  ;;  %v118_v47 = vld [vmem:[#allocation5 + $0x10] sm:$0xff] }
  0xa6   :  { %v4740_v49 = vcombine.high %v476_v44, %v480_v45  ;;  %v228_v50 = vld [vmem:[#allocation5 + $0x380] sm:$0xff]  ;;  %2589 = vmatprep.subr.bf16.mxu1 %v4484_v48  ;;  %v4739_v55 = vcombine.low %v476_v44, %v480_v45  ;;  %v5553_v44 = vpack.c.bf16 %v108_v39, %v108_v39  ;;  %v4765_v45 = vcombine.low %v501_v27, %v505_v28  ;;  %v122_v48 = vld [vmem:[#allocation5 + $0x30] sm:$0xff] }
  0xa7   :  { %v232_v51 = vld [vmem:[#allocation5 + $0x3a0] sm:$0xff]  ;;  %2590 = vmatpush1.bf16.msra.mxu1 %v4483_v54  ;;  %v158_v28 = vld [vmem:[#allocation5 + $0x150] sm:$0xff] }
  0xa8   :  { %v484_v52 = vld [vmem:[#allocation5 + $0xb80] sm:$0xff]  ;;  %v4492_v56 = vcombine.high %v228_v50, %v232_v51  ;;  %2671 = vmatprep.subr.bf16.mxu0 %v4740_v49  ;;  %v4491_v0 = vcombine.low %v228_v50, %v232_v51  ;;  %v4774_v49 = vcombine.high %v509_v40, %v509_v40  ;;  %v4773_v50 = vcombine.low %v509_v40, %v509_v40  ;;  %v170_v39 = vld [vmem:[#allocation5 + $0x1b0] sm:$0xff] }
  0xa9   :  { %v488_v53 = vld [vmem:[#allocation5 + $0xba0] sm:$0xff]  ;;  %2672 = vmatpush1.bf16.msra.mxu0 %v4739_v55  ;;  %v126_v55 = vld [vmem:[#allocation5 + $0x50] sm:$0xff] }
  0xaa   :  { %v4748_v57 = vcombine.high %v484_v52, %v488_v53  ;;  %v236_v60 = vld [vmem:[#allocation5 + $0x3c0] sm:$0xff]  ;;  %2591 = vmatprep.subr.bf16.mxu1 %v4492_v56  ;;  %v4747_v1 = vcombine.low %v484_v52, %v488_v53  ;;  %v130_v56 = vld [vmem:[#allocation5 + $0x70] sm:$0xff] }
  0xab   :  { %v240_v61 = vld [vmem:[#allocation5 + $0x3e0] sm:$0xff]  ;;  %2592 = vmatpush1.bf16.msra.mxu1 %v4491_v0  ;;  %v4383_v0 = vcombine.low %v118_v47, %v122_v48 }
  0xac   :  { %v492_v62 = vld [vmem:[#allocation5 + $0xbc0] sm:$0xff]  ;;  %v4500_v2 = vcombine.high %v236_v60, %v240_v61  ;;  %2673 = vmatprep.subr.bf16.mxu0 %v4748_v57  ;;  %v4499_v8 = vcombine.low %v236_v60, %v240_v61  ;;  %v2546_v57 = vsel %vm2538_vm0, %v4773_v50, 0  ;;  %v4384_v60 = vcombine.high %v118_v47, %v122_v48  ;;  %v174_v47 = vld [vmem:[#allocation5 + $0x1d0] sm:$0xff] }
  0xad   :  { %v496_v63 = vld [vmem:[#allocation5 + $0xbe0] sm:$0xff]  ;;  %2674 = vmatpush1.bf16.msra.mxu0 %v4747_v1  ;;  %v178_v48 = vld [vmem:[#allocation5 + $0x1f0] sm:$0xff] }
  0xae   :  { %v4756_v3 = vcombine.high %v492_v62, %v496_v63  ;;  %v244_v4 = vld [vmem:[#allocation5 + $0x400] sm:$0xff]  ;;  %2593 = vmatprep.subr.bf16.mxu1 %v4500_v2  ;;  %v4755_v10 = vcombine.low %v492_v62, %v496_v63  ;;  %v134_v2 = vld [vmem:[#allocation5 + $0x90] sm:$0xff] }
  0xaf   :  { %v248_v5 = vld [vmem:[#allocation5 + $0x420] sm:$0xff]  ;;  %2594 = vmatpush1.bf16.msra.mxu1 %v4499_v8  ;;  %v4391_v8 = vcombine.low %v126_v55, %v130_v56 }
  0xb0   :  { %v500_v6 = vld [vmem:[#allocation5 + $0xc00] sm:$0xff]  ;;  %v4508_v11 = vcombine.high %v244_v4, %v248_v5  ;;  %2675 = vmatprep.subr.bf16.mxu0 %v4756_v3  ;;  %v4507_v18 = vcombine.low %v244_v4, %v248_v5  ;;  %v138_v3 = vld [vmem:[#allocation5 + $0xb0] sm:$0xff]  ;;  %v4392_v4 = vcombine.high %v126_v55, %v130_v56 }
  0xb1   :  { %v504_v7 = vld [vmem:[#allocation5 + $0xc20] sm:$0xff]  ;;  %2676 = vmatpush1.bf16.msra.mxu0 %v4755_v10  ;;  %v142_v10 = vld [vmem:[#allocation5 + $0xd0] sm:$0xff]  ;;  %v4400_v12 = vcombine.high %v134_v2, %v138_v3 }
  0xb2   :  { %v4764_v13 = vcombine.high %v500_v6, %v504_v7  ;;  %v252_v14 = vld [vmem:[#allocation5 + $0x440] sm:$0xff]  ;;  %2604 = vmatprep.subr.bf16.mxu1 %v4508_v11  ;;  %v4763_v21 = vcombine.low %v500_v6, %v504_v7  ;;  %2596 = vmatmul.mubr.bf16.vlgmr.msra.gmra.mrb[0].mxu1 %v5541_v16  ;;  %v146_v11 = vld [vmem:[#allocation5 + $0xf0] sm:$0xff] }
  0xb3   :  { %v256_v15 = vld [vmem:[#allocation5 + $0x460] sm:$0xff]  ;;  %2605 = vmatpush1.bf16.msra.mxu1 %v4507_v18  ;;  %v182_v55 = vld [vmem:[#allocation5 + $0x210] sm:$0xff] }
  0xb4   :  { %v508_v17 = vld [vmem:[#allocation5 + $0xc40] sm:$0xff]  ;;  %v4516_v22 = vcombine.high %v252_v14, %v256_v15  ;;  %2686 = vmatprep.subr.bf16.mxu0 %v4764_v13  ;;  %2678 = vmatmul.mubr.bf16.vlgmr.msra.gmra.mrb[0].mxu0 %v5543_v19  ;;  %v4515_v30 = vcombine.low %v252_v14, %v256_v15  ;;  %v186_v56 = vld [vmem:[#allocation5 + $0x230] sm:$0xff] }
  0xb5   :  { %v105_v20 = vld [vmem:[#allocation2 + $0x18] sm:$0xff]  ;;  %v4772_v25 = vcombine.high %v508_v17, %v508_v17  ;;  %v4771_v26 = vcombine.low %v508_v17, %v508_v17  ;;  %2687 = vmatpush1.bf16.msra.mxu0 %v4763_v21  ;;  %2718 = vmatprep.mubr.bf16.mxu0 %v5421_v33  ;;  %v4399_v17 = vcombine.low %v134_v2, %v138_v3  ;;  %v154_v21 = vld [vmem:[#allocation5 + $0x130] sm:$0xff] }
  0xb6   :  { %v260_v23 = vld [vmem:[#allocation5 + $0x480] sm:$0xff]  ;;  %v5546_v29 = vpack.c.bf16 %v105_v20, %v105_v20  ;;  %2606 = vmatprep.subr.bf16.mxu1 %v4516_v22  ;;  %v150_v20 = vld [vmem:[#allocation5 + $0x110] sm:$0xff]  ;;  %v4408_v22 = vcombine.high %v142_v10, %v146_v11  ;;  %v4448_v3 = vcombine.high %v182_v55, %v186_v56 }
  0xb7   :  { %v264_v24 = vld [vmem:[#allocation5 + $0x4a0] sm:$0xff]  ;;  %4779 = vmatprep.subr.msk.bf16.mxu0 %vm2538_vm0, %v4772_v25  ;;  %v2540_v32 = vsel %vm2538_vm0, %v4771_v26, 0  ;;  %2607 = vmatpush1.bf16.msra.mxu1 %v4515_v30  ;;  %v4407_v26 = vcombine.low %v142_v10, %v146_v11  ;;  %v162_v30 = vld [vmem:[#allocation5 + $0x170] sm:$0xff] }
  0xb8   :  { %v4524_v31 = vcombine.high %v260_v23, %v264_v24  ;;  %v268_v35 = vld [vmem:[#allocation5 + $0x4c0] sm:$0xff]  ;;  %2636 = vmatprep.mubr.bf16.mxu1 %v5546_v29  ;;  %v4523_v37 = vcombine.low %v260_v23, %v264_v24  ;;  %v4424_v40 = vcombine.high %v158_v28, %v162_v30  ;;  %v194_v2 = vld [vmem:[#allocation5 + $0x270] sm:$0xff] }
  0xb9   :  { %v272_v36 = vld [vmem:[#allocation5 + $0x4e0] sm:$0xff]  ;;  %2689 = vmatpush1.bf16.msra.mxu0 %v2540_v32  ;;  %v202_v10 = vld [vmem:[#allocation5 + $0x2b0] sm:$0xff] }
  0xba   :  { %2608 = vmatprep.subr.bf16.mxu1 %v4524_v31  ;;  %v4532_v38 = vcombine.high %v268_v35, %v272_v36  ;;  %2850 = vmatprep.subr.bf16.mxu0 %v4766_v34  ;;  %v276_v41 = vld [vmem:[#allocation5 + $0x500] sm:$0xff]  ;;  %v4531_v43 = vcombine.low %v268_v35, %v272_v36  ;;  %v4416_v31 = vcombine.high %v150_v20, %v154_v21 }
  0xbb   :  { %v280_v42 = vld [vmem:[#allocation5 + $0x520] sm:$0xff]  ;;  %2609 = vmatpush1.bf16.msra.mxu1 %v4523_v37  ;;  %v4415_v36 = vcombine.low %v150_v20, %v154_v21  ;;  %v210_v20 = vld [vmem:[#allocation5 + $0x2f0] sm:$0xff] }
  0xbc   :  { %2610 = vmatprep.subr.bf16.mxu1 %v4532_v38  ;;  %v4540_v46 = vcombine.high %v276_v41, %v280_v42  ;;  %v284_v51 = vld [vmem:[#allocation5 + $0x540] sm:$0xff]  ;;  %v4539_v53 = vcombine.low %v276_v41, %v280_v42  ;;  %v166_v38 = vld [vmem:[#allocation5 + $0x190] sm:$0xff] }
  0xbd   :  { %v288_v52 = vld [vmem:[#allocation5 + $0x560] sm:$0xff] }
  0xbe   :  { %v4548_v54 = vcombine.high %v284_v51, %v288_v52  ;;  %v292_v61 = vld [vmem:[#allocation5 + $0x580] sm:$0xff]  ;;  %v4547_v63 = vcombine.low %v284_v51, %v288_v52 }
  0xbf   :  { %2611 = vmatpush1.bf16.msra.mxu1 %v4531_v43  ;;  %v296_v62 = vld [vmem:[#allocation5 + $0x5a0] sm:$0xff] }
  0xc0   :  { %4780 = vmatmul.mubr.msk.bf16.vlgmr.msra.gmra.mrb[0].mxu0 %vm2534_vm1, %v5553_v44  ;;  %2612 = vmatprep.subr.bf16.mxu1 %v4540_v46  ;;  %v4556_v1 = vcombine.high %v292_v61, %v296_v62  ;;  %v300_v5 = vld [vmem:[#allocation5 + $0x5c0] sm:$0xff]  ;;  %v4555_v7 = vcombine.low %v292_v61, %v296_v62 }
  0xc1   :  { %2851 = vmatpush1.bf16.msra.mxu0 %v4765_v45  ;;  %2882 = vmatprep.mubr.bf16.mxu0 %v5421_v33  ;;  %v304_v6 = vld [vmem:[#allocation5 + $0x5e0] sm:$0xff]  ;;  %v4423_v45 = vcombine.low %v158_v28, %v162_v30  ;;  %v214_v28 = vld [vmem:[#allocation5 + $0x310] sm:$0xff] }
  0xc2   :  { %4781 = vmatprep.subr.msk.bf16.mxu0 %vm2538_vm0, %v4774_v49  ;;  %v4564_v9 = vcombine.high %v300_v5, %v304_v6  ;;  %v308_v13 = vld [vmem:[#allocation5 + $0x600] sm:$0xff]  ;;  %v4563_v15 = vcombine.low %v300_v5, %v304_v6  ;;  %v4432_v49 = vcombine.high %v166_v38, %v170_v39  ;;  %v218_v30 = vld [vmem:[#allocation5 + $0x330] sm:$0xff] }
  0xc3   :  { %2613 = vmatpush1.bf16.msra.mxu1 %v4539_v53  ;;  %v312_v14 = vld [vmem:[#allocation5 + $0x620] sm:$0xff]  ;;  %v4431_v53 = vcombine.low %v166_v38, %v170_v39  ;;  %v222_v39 = vld [vmem:[#allocation5 + $0x350] sm:$0xff] }
  0xc4   :  { %2614 = vmatprep.subr.bf16.mxu1 %v4548_v54  ;;  %v4572_v18 = vcombine.high %v308_v13, %v312_v14  ;;  %v316_v23 = vld [vmem:[#allocation5 + $0x640] sm:$0xff]  ;;  %v4571_v25 = vcombine.low %v308_v13, %v312_v14 }
  0xc5   :  { %2853 = vmatpush1.bf16.msra.mxu0 %v2546_v57  ;;  %v320_v24 = vld [vmem:[#allocation5 + $0x660] sm:$0xff]  ;;  %v4440_v57 = vcombine.high %v174_v47, %v178_v48 }
  0xc6   :  { %2891 = vmatprep.subr.bf16.mxu0 %v4384_v60  ;;  %v4580_v27 = vcombine.high %v316_v23, %v320_v24  ;;  %v324_v32 = vld [vmem:[#allocation5 + $0x680] sm:$0xff]  ;;  %v4579_v35 = vcombine.low %v316_v23, %v320_v24  ;;  %v117_v23 = vld [vmem:[#allocation5 + $0x8] sm:$0xff] }
  0xc7   :  { %2615 = vmatpush1.bf16.msra.mxu1 %v4547_v63  ;;  %v328_v34 = vld [vmem:[#allocation5 + $0x6a0] sm:$0xff]  ;;  %v4439_v63 = vcombine.low %v174_v47, %v178_v48  ;;  %v121_v24 = vld [vmem:[#allocation5 + $0x28] sm:$0xff]  ;;  %v230_v48 = vld [vmem:[#allocation5 + $0x390] sm:$0xff] }
  0xc8   :  { %4782 = vmatmul.mubr.msk.bf16.vlgmr.msra.gmra.mrb[4].mxu0 %vm2534_vm1, %v5553_v44  ;;  %2616 = vmatprep.subr.bf16.mxu1 %v4556_v1  ;;  %v4588_v37 = vcombine.high %v324_v32, %v328_v34  ;;  %v332_v41 = vld [vmem:[#allocation5 + $0x6c0] sm:$0xff]  ;;  %v4587_v43 = vcombine.low %v324_v32, %v328_v34  ;;  %v190_v1 = vld [vmem:[#allocation5 + $0x250] sm:$0xff]  ;;  %v125_v32 = vld [vmem:[#allocation5 + $0x48] sm:$0xff] }
  0xc9   :  { %2892 = vmatpush1.bf16.msra.mxu0 %v4383_v0  ;;  %2923 = vmatprep.mubr.bf16.mxu0 %v5537_v59  ;;  %v336_v42 = vld [vmem:[#allocation5 + $0x6e0] sm:$0xff]  ;;  %v4456_v11 = vcombine.high %v190_v1, %v194_v2  ;;  %v129_v34 = vld [vmem:[#allocation5 + $0x68] sm:$0xff] }
  0xca   :  { %2893 = vmatprep.subr.bf16.mxu0 %v4392_v4  ;;  %v4596_v46 = vcombine.high %v332_v41, %v336_v42  ;;  %v340_v50 = vld [vmem:[#allocation5 + $0x700] sm:$0xff]  ;;  %v4595_v52 = vcombine.low %v332_v41, %v336_v42  ;;  %v4390_v38 = vcombine.high %v125_v32, %v129_v34  ;;  %v4480_v41 = vcombine.high %v214_v28, %v218_v30  ;;  %v133_v42 = vld [vmem:[#allocation5 + $0x88] sm:$0xff] }
  0xcb   :  { %2617 = vmatpush1.bf16.msra.mxu1 %v4555_v7  ;;  %v344_v51 = vld [vmem:[#allocation5 + $0x720] sm:$0xff]  ;;  %v4447_v7 = vcombine.low %v182_v55, %v186_v56  ;;  %v238_v56 = vld [vmem:[#allocation5 + $0x3d0] sm:$0xff] }
  0xcc   :  { %2618 = vmatprep.subr.bf16.mxu1 %v4564_v9  ;;  %v4604_v54 = vcombine.high %v340_v50, %v344_v51  ;;  %v348_v60 = vld [vmem:[#allocation5 + $0x740] sm:$0xff]  ;;  %v4603_v62 = vcombine.low %v340_v50, %v344_v51  ;;  %v198_v9 = vld [vmem:[#allocation5 + $0x290] sm:$0xff]  ;;  %v141_v51 = vld [vmem:[#allocation5 + $0xc8] sm:$0xff] }
  0xcd   :  { %2894 = vmatpush1.bf16.msra.mxu0 %v4391_v8  ;;  %v352_v61 = vld [vmem:[#allocation5 + $0x760] sm:$0xff]  ;;  %v4464_v21 = vcombine.high %v198_v9, %v202_v10 }
  0xce   :  { %2895 = vmatprep.subr.bf16.mxu0 %v4400_v12  ;;  %v4612_v0 = vcombine.high %v348_v60, %v352_v61  ;;  %v356_v4 = vld [vmem:[#allocation5 + $0x780] sm:$0xff]  ;;  %v4611_v6 = vcombine.low %v348_v60, %v352_v61  ;;  %v149_v61 = vld [vmem:[#allocation5 + $0x108] sm:$0xff] }
  0xcf   :  { %2619 = vmatpush1.bf16.msra.mxu1 %v4563_v15  ;;  %v360_v5 = vld [vmem:[#allocation5 + $0x7a0] sm:$0xff]  ;;  %v4455_v15 = vcombine.low %v190_v1, %v194_v2  ;;  %v246_v2 = vld [vmem:[#allocation5 + $0x410] sm:$0xff] }
  0xd0   :  { %2620 = vmatprep.subr.bf16.mxu1 %v4572_v18  ;;  %v4620_v8 = vcombine.high %v356_v4, %v360_v5  ;;  %v364_v12 = vld [vmem:[#allocation5 + $0x7c0] sm:$0xff]  ;;  %v4619_v14 = vcombine.low %v356_v4, %v360_v5  ;;  %v206_v18 = vld [vmem:[#allocation5 + $0x2d0] sm:$0xff]  ;;  %v157_v5 = vld [vmem:[#allocation5 + $0x148] sm:$0xff] }
  0xd1   :  { %2896 = vmatpush1.bf16.msra.mxu0 %v4399_v17  ;;  %v368_v13 = vld [vmem:[#allocation5 + $0x7e0] sm:$0xff] }
  0xd2   :  { %2897 = vmatprep.subr.bf16.mxu0 %v4408_v22  ;;  %v4628_v17 = vcombine.high %v364_v12, %v368_v13  ;;  %v104_v22 = vld [vmem:[#allocation2 + $0x10] sm:$0xff] }
  0xd3   :  { %2621 = vmatpush1.bf16.msra.mxu1 %v4571_v25  ;;  %v4627_v25 = vcombine.low %v364_v12, %v368_v13  ;;  %v169_v12 = vld [vmem:[#allocation5 + $0x1a8] sm:$0xff]  ;;  %v254_v13 = vld [vmem:[#allocation5 + $0x450] sm:$0xff] }
  0xd4   :  { %2622 = vmatprep.subr.bf16.mxu1 %v4580_v27  ;;  %v4382_v27 = vcombine.high %v117_v23, %v121_v24 }
  0xd5   :  { %2898 = vmatpush1.bf16.msra.mxu0 %v4407_v26  ;;  %v4463_v26 = vcombine.low %v198_v9, %v202_v10 }
  0xd6   :  { %2899 = vmatprep.subr.bf16.mxu0 %v4416_v31  ;;  %v4472_v31 = vcombine.high %v206_v18, %v210_v20 }
  0xd7   :  { %2623 = vmatpush1.bf16.msra.mxu1 %v4579_v35  ;;  %v5563_v35 = vpack.c.bf16 %v104_v22, %v104_v22  ;;  %v177_v22 = vld [vmem:[#allocation5 + $0x1e8] sm:$0xff] }
  0xd8   :  { %2624 = vmatprep.subr.bf16.mxu1 %v4588_v37  ;;  %v4471_v37 = vcombine.low %v206_v18, %v210_v20 }
  0xd9   :  { %2900 = vmatpush1.bf16.msra.mxu0 %v4415_v36  ;;  %v4381_v36 = vcombine.low %v117_v23, %v121_v24  ;;  %v262_v23 = vld [vmem:[#allocation5 + $0x490] sm:$0xff] }
  0xda   :  { %2901 = vmatprep.subr.bf16.mxu0 %v4424_v40  ;;  %v226_v40 = vld [vmem:[#allocation5 + $0x370] sm:$0xff] }
  0xdb   :  { %2625 = vmatpush1.bf16.msra.mxu1 %v4587_v43  ;;  %v137_v43 = vld [vmem:[#allocation5 + $0xa8] sm:$0xff]  ;;  %v4488_v50 = vcombine.high %v222_v39, %v226_v40  ;;  %v266_v24 = vld [vmem:[#allocation5 + $0x4b0] sm:$0xff] }
  0xdc   :  { %2626 = vmatprep.subr.bf16.mxu1 %v4596_v46  ;;  %v4479_v46 = vcombine.low %v214_v28, %v218_v30  ;;  %v4398_v47 = vcombine.high %v133_v42, %v137_v43  ;;  %v4528_v28 = vcombine.high %v262_v23, %v266_v24  ;;  %v181_v30 = vld [vmem:[#allocation5 + $0x208] sm:$0xff] }
  0xdd   :  { %2902 = vmatpush1.bf16.msra.mxu0 %v4423_v45  ;;  %v4389_v45 = vcombine.low %v125_v32, %v129_v34  ;;  %v270_v32 = vld [vmem:[#allocation5 + $0x4d0] sm:$0xff] }
  0xde   :  { %2903 = vmatprep.subr.bf16.mxu0 %v4432_v49  ;;  %v234_v49 = vld [vmem:[#allocation5 + $0x3b0] sm:$0xff] }
  0xdf   :  { %2627 = vmatpush1.bf16.msra.mxu1 %v4595_v52  ;;  %v145_v52 = vld [vmem:[#allocation5 + $0xe8] sm:$0xff]  ;;  %v4496_v60 = vcombine.high %v230_v48, %v234_v49  ;;  %v274_v34 = vld [vmem:[#allocation5 + $0x4f0] sm:$0xff] }
  0xe0   :  { %2628 = vmatprep.subr.bf16.mxu1 %v4604_v54  ;;  %v4487_v54 = vcombine.low %v222_v39, %v226_v40  ;;  %v4406_v55 = vcombine.high %v141_v51, %v145_v52  ;;  %v4536_v39 = vcombine.high %v270_v32, %v274_v34  ;;  %v189_v40 = vld [vmem:[#allocation5 + $0x248] sm:$0xff] }
  0xe1   :  { %2904 = vmatpush1.bf16.msra.mxu0 %v4431_v53  ;;  %v4397_v53 = vcombine.low %v133_v42, %v137_v43  ;;  %v278_v42 = vld [vmem:[#allocation5 + $0x510] sm:$0xff] }
  0xe2   :  { %2905 = vmatprep.subr.bf16.mxu0 %v4440_v57  ;;  %v242_v57 = vld [vmem:[#allocation5 + $0x3f0] sm:$0xff] }
  0xe3   :  { %2629 = vmatpush1.bf16.msra.mxu1 %v4603_v62  ;;  %v153_v62 = vld [vmem:[#allocation5 + $0x128] sm:$0xff]  ;;  %v4504_v4 = vcombine.high %v238_v56, %v242_v57  ;;  %v282_v43 = vld [vmem:[#allocation5 + $0x530] sm:$0xff] }
  0xe4   :  { %2630 = vmatprep.subr.bf16.mxu1 %v4612_v0  ;;  %v4495_v0 = vcombine.low %v230_v48, %v234_v49  ;;  %v4414_v1 = vcombine.high %v149_v61, %v153_v62  ;;  %v4544_v48 = vcombine.high %v278_v42, %v282_v43  ;;  %v197_v49 = vld [vmem:[#allocation5 + $0x288] sm:$0xff] }
  0xe5   :  { %2906 = vmatpush1.bf16.msra.mxu0 %v4439_v63  ;;  %v4405_v63 = vcombine.low %v141_v51, %v145_v52  ;;  %v286_v51 = vld [vmem:[#allocation5 + $0x550] sm:$0xff] }
  0xe6   :  { %2907 = vmatprep.subr.bf16.mxu0 %v4448_v3  ;;  %v250_v3 = vld [vmem:[#allocation5 + $0x430] sm:$0xff] }
  0xe7   :  { %2631 = vmatpush1.bf16.msra.mxu1 %v4611_v6  ;;  %v161_v6 = vld [vmem:[#allocation5 + $0x168] sm:$0xff]  ;;  %v4512_v10 = vcombine.high %v246_v2, %v250_v3  ;;  %v290_v52 = vld [vmem:[#allocation5 + $0x570] sm:$0xff] }
  0xe8   :  { %2632 = vmatprep.subr.bf16.mxu1 %v4620_v8  ;;  %v4503_v8 = vcombine.low %v238_v56, %v242_v57  ;;  %v4422_v9 = vcombine.high %v157_v5, %v161_v6  ;;  %v4552_v56 = vcombine.high %v286_v51, %v290_v52  ;;  %v205_v57 = vld [vmem:[#allocation5 + $0x2c8] sm:$0xff] }
  0xe9   :  { %2908 = vmatpush1.bf16.msra.mxu0 %v4447_v7  ;;  %v4413_v7 = vcombine.low %v149_v61, %v153_v62  ;;  %v294_v61 = vld [vmem:[#allocation5 + $0x590] sm:$0xff] }
  0xea   :  { %2909 = vmatprep.subr.bf16.mxu0 %v4456_v11  ;;  %v165_v11 = vld [vmem:[#allocation5 + $0x188] sm:$0xff]  ;;  %v298_v62 = vld [vmem:[#allocation5 + $0x5b0] sm:$0xff] }
  0xeb   :  { %2633 = vmatpush1.bf16.msra.mxu1 %v4619_v14  ;;  %v258_v14 = vld [vmem:[#allocation5 + $0x470] sm:$0xff]  ;;  %v4430_v18 = vcombine.high %v165_v11, %v169_v12 }
  0xec   :  { %2634 = vmatprep.subr.bf16.mxu1 %v4628_v17  ;;  %v4511_v17 = vcombine.low %v246_v2, %v250_v3  ;;  %v4520_v20 = vcombine.high %v254_v13, %v258_v14  ;;  %v4560_v2 = vcombine.high %v294_v61, %v298_v62  ;;  %v213_v3 = vld [vmem:[#allocation5 + $0x308] sm:$0xff] }
  0xed   :  { %2910 = vmatpush1.bf16.msra.mxu0 %v4455_v15  ;;  %v4421_v15 = vcombine.low %v157_v5, %v161_v6  ;;  %v302_v5 = vld [vmem:[#allocation5 + $0x5d0] sm:$0xff] }
  0xee   :  { %2911 = vmatprep.subr.bf16.mxu0 %v4464_v21  ;;  %v173_v21 = vld [vmem:[#allocation5 + $0x1c8] sm:$0xff]  ;;  %v306_v6 = vld [vmem:[#allocation5 + $0x5f0] sm:$0xff] }
  0xef   :  { %2635 = vmatpush1.bf16.msra.mxu1 %v4627_v25  ;;  %v4429_v25 = vcombine.low %v165_v11, %v169_v12  ;;  %v221_v11 = vld [vmem:[#allocation5 + $0x348] sm:$0xff] }
  0xf0   :  { %2727 = vmatprep.subr.bf16.mxu1 %v4382_v27  ;;  %v4438_v27 = vcombine.high %v173_v21, %v177_v22  ;;  %v225_v12 = vld [vmem:[#allocation5 + $0x368] sm:$0xff] }
  0xf1   :  { %2912 = vmatpush1.bf16.msra.mxu0 %v4463_v26  ;;  %v4519_v26 = vcombine.low %v254_v13, %v258_v14  ;;  %v310_v13 = vld [vmem:[#allocation5 + $0x610] sm:$0xff] }
  0xf2   :  { %2913 = vmatprep.subr.bf16.mxu0 %v4472_v31  ;;  %2637 = vmatmul.mubr.bf16.vlgmr.msra.gmra.mrb[0].mxu1 %v5563_v35  ;;  %v185_v31 = vld [vmem:[#allocation5 + $0x228] sm:$0xff]  ;;  %v314_v14 = vld [vmem:[#allocation5 + $0x630] sm:$0xff] }
  0xf3   :  { %2728 = vmatpush1.bf16.msra.mxu1 %v4381_v36  ;;  %2759 = vmatprep.mubr.bf16.mxu1 %v5537_v59  ;;  %v4437_v36 = vcombine.low %v173_v21, %v177_v22  ;;  %v229_v21 = vld [vmem:[#allocation5 + $0x388] sm:$0xff] }
  0xf4   :  { %2729 = vmatprep.subr.bf16.mxu1 %v4390_v38  ;;  %v4446_v38 = vcombine.high %v181_v30, %v185_v31  ;;  %v233_v22 = vld [vmem:[#allocation5 + $0x3a8] sm:$0xff] }
  0xf5   :  { %2914 = vmatpush1.bf16.msra.mxu0 %v4471_v37  ;;  %v4527_v37 = vcombine.low %v262_v23, %v266_v24  ;;  %v318_v23 = vld [vmem:[#allocation5 + $0x650] sm:$0xff] }
  0xf6   :  { %2915 = vmatprep.subr.bf16.mxu0 %v4480_v41  ;;  %v193_v41 = vld [vmem:[#allocation5 + $0x268] sm:$0xff]  ;;  %v322_v24 = vld [vmem:[#allocation5 + $0x670] sm:$0xff] }
  0xf7   :  { %2730 = vmatpush1.bf16.msra.mxu1 %v4389_v45  ;;  %v4445_v45 = vcombine.low %v181_v30, %v185_v31  ;;  %v237_v30 = vld [vmem:[#allocation5 + $0x3c8] sm:$0xff] }
  0xf8   :  { %2731 = vmatprep.subr.bf16.mxu1 %v4398_v47  ;;  %v4454_v47 = vcombine.high %v189_v40, %v193_v41  ;;  %v241_v31 = vld [vmem:[#allocation5 + $0x3e8] sm:$0xff] }
  0xf9   :  { %2916 = vmatpush1.bf16.msra.mxu0 %v4479_v46  ;;  %v4535_v46 = vcombine.low %v270_v32, %v274_v34  ;;  %v326_v32 = vld [vmem:[#allocation5 + $0x690] sm:$0xff] }
  0xfa   :  { %2917 = vmatprep.subr.bf16.mxu0 %v4488_v50  ;;  %v201_v50 = vld [vmem:[#allocation5 + $0x2a8] sm:$0xff]  ;;  %v330_v34 = vld [vmem:[#allocation5 + $0x6b0] sm:$0xff] }
  0xfb   :  { %2732 = vmatpush1.bf16.msra.mxu1 %v4397_v53  ;;  %v4453_v53 = vcombine.low %v189_v40, %v193_v41  ;;  %v245_v40 = vld [vmem:[#allocation5 + $0x408] sm:$0xff] }
  0xfc   :  { %2733 = vmatprep.subr.bf16.mxu1 %v4406_v55  ;;  %v4462_v55 = vcombine.high %v197_v49, %v201_v50  ;;  %v249_v41 = vld [vmem:[#allocation5 + $0x428] sm:$0xff] }
  0xfd   :  { %2918 = vmatpush1.bf16.msra.mxu0 %v4487_v54  ;;  %v4543_v54 = vcombine.low %v278_v42, %v282_v43  ;;  %v334_v42 = vld [vmem:[#allocation5 + $0x6d0] sm:$0xff] }
  0xfe   :  { %2919 = vmatprep.subr.bf16.mxu0 %v4496_v60  ;;  %v209_v60 = vld [vmem:[#allocation5 + $0x2e8] sm:$0xff]  ;;  %v338_v43 = vld [vmem:[#allocation5 + $0x6f0] sm:$0xff] }
  0xff   :  { %2734 = vmatpush1.bf16.msra.mxu1 %v4405_v63  ;;  %v4461_v63 = vcombine.low %v197_v49, %v201_v50  ;;  %v253_v49 = vld [vmem:[#allocation5 + $0x448] sm:$0xff] }
 0x100   :  { %2735 = vmatprep.subr.bf16.mxu1 %v4414_v1  ;;  %v4470_v1 = vcombine.high %v205_v57, %v209_v60  ;;  %v257_v50 = vld [vmem:[#allocation5 + $0x468] sm:$0xff] }
 0x101   :  { %2920 = vmatpush1.bf16.msra.mxu0 %v4495_v0  ;;  %v4551_v0 = vcombine.low %v286_v51, %v290_v52  ;;  %v342_v51 = vld [vmem:[#allocation5 + $0x710] sm:$0xff] }
 0x102   :  { %2921 = vmatprep.subr.bf16.mxu0 %v4504_v4  ;;  %v217_v4 = vld [vmem:[#allocation5 + $0x328] sm:$0xff]  ;;  %v346_v52 = vld [vmem:[#allocation5 + $0x730] sm:$0xff] }
 0x103   :  { %2736 = vmatpush1.bf16.msra.mxu1 %v4413_v7  ;;  %v4469_v7 = vcombine.low %v205_v57, %v209_v60  ;;  %v261_v57 = vld [vmem:[#allocation5 + $0x488] sm:$0xff] }
 0x104   :  { %2737 = vmatprep.subr.bf16.mxu1 %v4422_v9  ;;  %v4478_v9 = vcombine.high %v213_v3, %v217_v4  ;;  %v265_v60 = vld [vmem:[#allocation5 + $0x4a8] sm:$0xff] }
 0x105   :  { %2922 = vmatpush1.bf16.msra.mxu0 %v4503_v8  ;;  %v4559_v8 = vcombine.low %v294_v61, %v298_v62  ;;  %v350_v61 = vld [vmem:[#allocation5 + $0x750] sm:$0xff] }
 0x106   :  { %2932 = vmatprep.subr.bf16.mxu0 %v4512_v10  ;;  %v4568_v10 = vcombine.high %v302_v5, %v306_v6  ;;  %v354_v62 = vld [vmem:[#allocation5 + $0x770] sm:$0xff] }
 0x107   :  { %2738 = vmatpush1.bf16.msra.mxu1 %v4421_v15  ;;  %v4477_v15 = vcombine.low %v213_v3, %v217_v4  ;;  %v269_v3 = vld [vmem:[#allocation5 + $0x4c8] sm:$0xff] }
 0x108   :  { %2924 = vmatmul.mubr.bf16.vlgmr.msra.gmra.mrb[8].mxu0 %v5541_v16  ;;  %2739 = vmatprep.subr.bf16.mxu1 %v4430_v18  ;;  %v4486_v18 = vcombine.high %v221_v11, %v225_v12  ;;  %v273_v4 = vld [vmem:[#allocation5 + $0x4e8] sm:$0xff] }
 0x109   :  { %2933 = vmatpush1.bf16.msra.mxu0 %v4511_v17  ;;  %2964 = vmatprep.mubr.bf16.mxu0 %v5546_v29  ;;  %v4567_v17 = vcombine.low %v302_v5, %v306_v6  ;;  %v358_v5 = vld [vmem:[#allocation5 + $0x790] sm:$0xff] }
 0x10a   :  { %2934 = vmatprep.subr.bf16.mxu0 %v4520_v20  ;;  %v4576_v20 = vcombine.high %v310_v13, %v314_v14  ;;  %v362_v6 = vld [vmem:[#allocation5 + $0x7b0] sm:$0xff] }
 0x10b   :  { %2740 = vmatpush1.bf16.msra.mxu1 %v4429_v25  ;;  %v4485_v25 = vcombine.low %v221_v11, %v225_v12  ;;  %v277_v11 = vld [vmem:[#allocation5 + $0x508] sm:$0xff] }
 0x10c   :  { %2741 = vmatprep.subr.bf16.mxu1 %v4438_v27  ;;  %v4494_v27 = vcombine.high %v229_v21, %v233_v22  ;;  %v281_v12 = vld [vmem:[#allocation5 + $0x528] sm:$0xff] }
 0x10d   :  { %2935 = vmatpush1.bf16.msra.mxu0 %v4519_v26  ;;  %v4575_v26 = vcombine.low %v310_v13, %v314_v14  ;;  %v366_v13 = vld [vmem:[#allocation5 + $0x7d0] sm:$0xff] }
 0x10e   :  { %2936 = vmatprep.subr.bf16.mxu0 %v4528_v28  ;;  %v4584_v28 = vcombine.high %v318_v23, %v322_v24  ;;  %v370_v14 = vld [vmem:[#allocation5 + $0x7f0] sm:$0xff] }
 0x10f   :  { %2742 = vmatpush1.bf16.msra.mxu1 %v4437_v36  ;;  %v4493_v36 = vcombine.low %v229_v21, %v233_v22  ;;  %v285_v21 = vld [vmem:[#allocation5 + $0x548] sm:$0xff] }
 0x110   :  { %2743 = vmatprep.subr.bf16.mxu1 %v4446_v38  ;;  %v4502_v38 = vcombine.high %v237_v30, %v241_v31  ;;  %v289_v22 = vld [vmem:[#allocation5 + $0x568] sm:$0xff] }
 0x111   :  { %2937 = vmatpush1.bf16.msra.mxu0 %v4527_v37  ;;  %v4583_v37 = vcombine.low %v318_v23, %v322_v24  ;;  %v374_v23 = vld [vmem:[#allocation5 + $0x810] sm:$0xff] }
 0x112   :  { %2938 = vmatprep.subr.bf16.mxu0 %v4536_v39  ;;  %v4592_v39 = vcombine.high %v326_v32, %v330_v34  ;;  %v378_v24 = vld [vmem:[#allocation5 + $0x830] sm:$0xff] }
 0x113   :  { %2744 = vmatpush1.bf16.msra.mxu1 %v4445_v45  ;;  %v4501_v45 = vcombine.low %v237_v30, %v241_v31  ;;  %v293_v30 = vld [vmem:[#allocation5 + $0x588] sm:$0xff] }
 0x114   :  { %2745 = vmatprep.subr.bf16.mxu1 %v4454_v47  ;;  %v4510_v47 = vcombine.high %v245_v40, %v249_v41  ;;  %v297_v31 = vld [vmem:[#allocation5 + $0x5a8] sm:$0xff] }
 0x115   :  { %2939 = vmatpush1.bf16.msra.mxu0 %v4535_v46  ;;  %v4591_v46 = vcombine.low %v326_v32, %v330_v34  ;;  %v382_v32 = vld [vmem:[#allocation5 + $0x850] sm:$0xff] }
 0x116   :  { %2940 = vmatprep.subr.bf16.mxu0 %v4544_v48  ;;  %v4600_v48 = vcombine.high %v334_v42, %v338_v43  ;;  %v386_v34 = vld [vmem:[#allocation5 + $0x870] sm:$0xff] }
 0x117   :  { %2746 = vmatpush1.bf16.msra.mxu1 %v4453_v53  ;;  %v4509_v53 = vcombine.low %v245_v40, %v249_v41  ;;  %v301_v40 = vld [vmem:[#allocation5 + $0x5c8] sm:$0xff] }
 0x118   :  { %2747 = vmatprep.subr.bf16.mxu1 %v4462_v55  ;;  %v4518_v55 = vcombine.high %v253_v49, %v257_v50  ;;  %v305_v41 = vld [vmem:[#allocation5 + $0x5e8] sm:$0xff] }
 0x119   :  { %2941 = vmatpush1.bf16.msra.mxu0 %v4543_v54  ;;  %v4599_v54 = vcombine.low %v334_v42, %v338_v43  ;;  %v390_v42 = vld [vmem:[#allocation5 + $0x890] sm:$0xff] }
 0x11a   :  { %2942 = vmatprep.subr.bf16.mxu0 %v4552_v56  ;;  %v4608_v56 = vcombine.high %v342_v51, %v346_v52  ;;  %v394_v43 = vld [vmem:[#allocation5 + $0x8b0] sm:$0xff] }
 0x11b   :  { %2748 = vmatpush1.bf16.msra.mxu1 %v4461_v63  ;;  %v4517_v63 = vcombine.low %v253_v49, %v257_v50  ;;  %v309_v49 = vld [vmem:[#allocation5 + $0x608] sm:$0xff] }
 0x11c   :  { %2749 = vmatprep.subr.bf16.mxu1 %v4470_v1  ;;  %v4526_v1 = vcombine.high %v261_v57, %v265_v60  ;;  %v313_v50 = vld [vmem:[#allocation5 + $0x628] sm:$0xff] }
 0x11d   :  { %2943 = vmatpush1.bf16.msra.mxu0 %v4551_v0  ;;  %v4607_v0 = vcombine.low %v342_v51, %v346_v52  ;;  %v398_v51 = vld [vmem:[#allocation5 + $0x8d0] sm:$0xff] }
 0x11e   :  { %2944 = vmatprep.subr.bf16.mxu0 %v4560_v2  ;;  %v4616_v2 = vcombine.high %v350_v61, %v354_v62  ;;  %v402_v52 = vld [vmem:[#allocation5 + $0x8f0] sm:$0xff] }
 0x11f   :  { %2750 = vmatpush1.bf16.msra.mxu1 %v4469_v7  ;;  %v4525_v7 = vcombine.low %v261_v57, %v265_v60  ;;  %v317_v57 = vld [vmem:[#allocation5 + $0x648] sm:$0xff] }
 0x120   :  { %2751 = vmatprep.subr.bf16.mxu1 %v4478_v9  ;;  %v4534_v9 = vcombine.high %v269_v3, %v273_v4  ;;  %v321_v60 = vld [vmem:[#allocation5 + $0x668] sm:$0xff] }
 0x121   :  { %2945 = vmatpush1.bf16.msra.mxu0 %v4559_v8  ;;  %v4615_v8 = vcombine.low %v350_v61, %v354_v62  ;;  %v406_v61 = vld [vmem:[#allocation5 + $0x910] sm:$0xff] }
 0x122   :  { %2946 = vmatprep.subr.bf16.mxu0 %v4568_v10  ;;  %v4624_v10 = vcombine.high %v358_v5, %v362_v6  ;;  %v410_v62 = vld [vmem:[#allocation5 + $0x930] sm:$0xff] }
 0x123   :  { %2752 = vmatpush1.bf16.msra.mxu1 %v4477_v15  ;;  %v4533_v15 = vcombine.low %v269_v3, %v273_v4  ;;  %v325_v3 = vld [vmem:[#allocation5 + $0x688] sm:$0xff] }
 0x124   :  { %2753 = vmatprep.subr.bf16.mxu1 %v4486_v18  ;;  %v4542_v18 = vcombine.high %v277_v11, %v281_v12  ;;  %v329_v4 = vld [vmem:[#allocation5 + $0x6a8] sm:$0xff] }
 0x125   :  { %2947 = vmatpush1.bf16.msra.mxu0 %v4567_v17  ;;  %v4623_v17 = vcombine.low %v358_v5, %v362_v6  ;;  %v414_v5 = vld [vmem:[#allocation5 + $0x950] sm:$0xff] }
 0x126   :  { %2948 = vmatprep.subr.bf16.mxu0 %v4576_v20  ;;  %v4632_v20 = vcombine.high %v366_v13, %v370_v14  ;;  %v418_v6 = vld [vmem:[#allocation5 + $0x970] sm:$0xff] }
 0x127   :  { %2754 = vmatpush1.bf16.msra.mxu1 %v4485_v25  ;;  %v4541_v25 = vcombine.low %v277_v11, %v281_v12  ;;  %v333_v11 = vld [vmem:[#allocation5 + $0x6c8] sm:$0xff] }
 0x128   :  { %2755 = vmatprep.subr.bf16.mxu1 %v4494_v27  ;;  %v4550_v27 = vcombine.high %v285_v21, %v289_v22  ;;  %v337_v12 = vld [vmem:[#allocation5 + $0x6e8] sm:$0xff] }
 0x129   :  { %2949 = vmatpush1.bf16.msra.mxu0 %v4575_v26  ;;  %v4631_v26 = vcombine.low %v366_v13, %v370_v14  ;;  %v422_v13 = vld [vmem:[#allocation5 + $0x990] sm:$0xff] }
 0x12a   :  { %2950 = vmatprep.subr.bf16.mxu0 %v4584_v28  ;;  %v4640_v28 = vcombine.high %v374_v23, %v378_v24  ;;  %v426_v14 = vld [vmem:[#allocation5 + $0x9b0] sm:$0xff] }
 0x12b   :  { %2756 = vmatpush1.bf16.msra.mxu1 %v4493_v36  ;;  %v4549_v36 = vcombine.low %v285_v21, %v289_v22  ;;  %v341_v21 = vld [vmem:[#allocation5 + $0x708] sm:$0xff] }
 0x12c   :  { %2757 = vmatprep.subr.bf16.mxu1 %v4502_v38  ;;  %v4558_v38 = vcombine.high %v293_v30, %v297_v31  ;;  %v345_v22 = vld [vmem:[#allocation5 + $0x728] sm:$0xff] }
 0x12d   :  { %2951 = vmatpush1.bf16.msra.mxu0 %v4583_v37  ;;  %v4639_v37 = vcombine.low %v374_v23, %v378_v24  ;;  %v430_v23 = vld [vmem:[#allocation5 + $0x9d0] sm:$0xff] }
 0x12e   :  { %2952 = vmatprep.subr.bf16.mxu0 %v4592_v39  ;;  %v4648_v39 = vcombine.high %v382_v32, %v386_v34  ;;  %v434_v24 = vld [vmem:[#allocation5 + $0x9f0] sm:$0xff] }
 0x12f   :  { %2758 = vmatpush1.bf16.msra.mxu1 %v4501_v45  ;;  %v4557_v45 = vcombine.low %v293_v30, %v297_v31  ;;  %v349_v30 = vld [vmem:[#allocation5 + $0x748] sm:$0xff] }
 0x130   :  { %2768 = vmatprep.subr.bf16.mxu1 %v4510_v47  ;;  %v4566_v47 = vcombine.high %v301_v40, %v305_v41  ;;  %v353_v31 = vld [vmem:[#allocation5 + $0x768] sm:$0xff] }
 0x131   :  { %2953 = vmatpush1.bf16.msra.mxu0 %v4591_v46  ;;  %v4647_v46 = vcombine.low %v382_v32, %v386_v34  ;;  %v438_v32 = vld [vmem:[#allocation5 + $0xa10] sm:$0xff] }
 0x132   :  { %2954 = vmatprep.subr.bf16.mxu0 %v4600_v48  ;;  %2760 = vmatmul.mubr.bf16.vlgmr.msra.gmra.mrb[4].mxu1 %v5541_v16  ;;  %v4656_v48 = vcombine.high %v390_v42, %v394_v43  ;;  %v442_v34 = vld [vmem:[#allocation5 + $0xa30] sm:$0xff] }
 0x133   :  { %2769 = vmatpush1.bf16.msra.mxu1 %v4509_v53  ;;  %2800 = vmatprep.mubr.bf16.mxu1 %v5546_v29  ;;  %v4565_v53 = vcombine.low %v301_v40, %v305_v41  ;;  %v357_v40 = vld [vmem:[#allocation5 + $0x788] sm:$0xff] }
 0x134   :  { %2770 = vmatprep.subr.bf16.mxu1 %v4518_v55  ;;  %v4574_v55 = vcombine.high %v309_v49, %v313_v50  ;;  %v361_v41 = vld [vmem:[#allocation5 + $0x7a8] sm:$0xff] }
 0x135   :  { %2955 = vmatpush1.bf16.msra.mxu0 %v4599_v54  ;;  %v4655_v54 = vcombine.low %v390_v42, %v394_v43  ;;  %v446_v42 = vld [vmem:[#allocation5 + $0xa50] sm:$0xff] }
 0x136   :  { %2956 = vmatprep.subr.bf16.mxu0 %v4608_v56  ;;  %v4664_v56 = vcombine.high %v398_v51, %v402_v52  ;;  %v450_v43 = vld [vmem:[#allocation5 + $0xa70] sm:$0xff] }
 0x137   :  { %2771 = vmatpush1.bf16.msra.mxu1 %v4517_v63  ;;  %v4573_v63 = vcombine.low %v309_v49, %v313_v50  ;;  %v365_v49 = vld [vmem:[#allocation5 + $0x7c8] sm:$0xff] }
 0x138   :  { %2772 = vmatprep.subr.bf16.mxu1 %v4526_v1  ;;  %v4582_v1 = vcombine.high %v317_v57, %v321_v60  ;;  %v369_v50 = vld [vmem:[#allocation5 + $0x7e8] sm:$0xff] }
 0x139   :  { %2957 = vmatpush1.bf16.msra.mxu0 %v4607_v0  ;;  %v4663_v0 = vcombine.low %v398_v51, %v402_v52  ;;  %v454_v51 = vld [vmem:[#allocation5 + $0xa90] sm:$0xff] }
 0x13a   :  { %2958 = vmatprep.subr.bf16.mxu0 %v4616_v2  ;;  %v4672_v2 = vcombine.high %v406_v61, %v410_v62  ;;  %v458_v52 = vld [vmem:[#allocation5 + $0xab0] sm:$0xff] }
 0x13b   :  { %2773 = vmatpush1.bf16.msra.mxu1 %v4525_v7  ;;  %v4581_v7 = vcombine.low %v317_v57, %v321_v60  ;;  %v373_v57 = vld [vmem:[#allocation5 + $0x808] sm:$0xff] }
 0x13c   :  { %2774 = vmatprep.subr.bf16.mxu1 %v4534_v9  ;;  %v4590_v9 = vcombine.high %v325_v3, %v329_v4  ;;  %v377_v60 = vld [vmem:[#allocation5 + $0x828] sm:$0xff] }
 0x13d   :  { %2959 = vmatpush1.bf16.msra.mxu0 %v4615_v8  ;;  %v4671_v8 = vcombine.low %v406_v61, %v410_v62  ;;  %v462_v61 = vld [vmem:[#allocation5 + $0xad0] sm:$0xff] }
 0x13e   :  { %2960 = vmatprep.subr.bf16.mxu0 %v4624_v10  ;;  %v4680_v10 = vcombine.high %v414_v5, %v418_v6  ;;  %v466_v62 = vld [vmem:[#allocation5 + $0xaf0] sm:$0xff] }
 0x13f   :  { %2775 = vmatpush1.bf16.msra.mxu1 %v4533_v15  ;;  %v4589_v15 = vcombine.low %v325_v3, %v329_v4  ;;  %v381_v3 = vld [vmem:[#allocation5 + $0x848] sm:$0xff] }
 0x140   :  { %2776 = vmatprep.subr.bf16.mxu1 %v4542_v18  ;;  %v4598_v18 = vcombine.high %v333_v11, %v337_v12  ;;  %v385_v4 = vld [vmem:[#allocation5 + $0x868] sm:$0xff] }
 0x141   :  { %2961 = vmatpush1.bf16.msra.mxu0 %v4623_v17  ;;  %v4679_v17 = vcombine.low %v414_v5, %v418_v6  ;;  %v470_v5 = vld [vmem:[#allocation5 + $0xb10] sm:$0xff] }
 0x142   :  { %2962 = vmatprep.subr.bf16.mxu0 %v4632_v20  ;;  %v4688_v20 = vcombine.high %v422_v13, %v426_v14  ;;  %v474_v6 = vld [vmem:[#allocation5 + $0xb30] sm:$0xff] }
 0x143   :  { %2777 = vmatpush1.bf16.msra.mxu1 %v4541_v25  ;;  %v4597_v25 = vcombine.low %v333_v11, %v337_v12  ;;  %v389_v11 = vld [vmem:[#allocation5 + $0x888] sm:$0xff] }
 0x144   :  { %2778 = vmatprep.subr.bf16.mxu1 %v4550_v27  ;;  %v4606_v27 = vcombine.high %v341_v21, %v345_v22  ;;  %v393_v12 = vld [vmem:[#allocation5 + $0x8a8] sm:$0xff] }
 0x145   :  { %2963 = vmatpush1.bf16.msra.mxu0 %v4631_v26  ;;  %v4687_v26 = vcombine.low %v422_v13, %v426_v14  ;;  %v478_v13 = vld [vmem:[#allocation5 + $0xb50] sm:$0xff] }
 0x146   :  { %2973 = vmatprep.subr.bf16.mxu0 %v4640_v28  ;;  %v4696_v28 = vcombine.high %v430_v23, %v434_v24  ;;  %v482_v14 = vld [vmem:[#allocation5 + $0xb70] sm:$0xff] }
 0x147   :  { %2779 = vmatpush1.bf16.msra.mxu1 %v4549_v36  ;;  %v4605_v36 = vcombine.low %v341_v21, %v345_v22  ;;  %v397_v21 = vld [vmem:[#allocation5 + $0x8c8] sm:$0xff] }
 0x148   :  { %2965 = vmatmul.mubr.bf16.vlgmr.msra.gmra.mrb[8].mxu0 %v5563_v35  ;;  %2780 = vmatprep.subr.bf16.mxu1 %v4558_v38  ;;  %v4614_v38 = vcombine.high %v349_v30, %v353_v31  ;;  %v401_v22 = vld [vmem:[#allocation5 + $0x8e8] sm:$0xff] }
 0x149   :  { %2974 = vmatpush1.bf16.msra.mxu0 %v4639_v37  ;;  %3005 = vmatprep.mubr.bf16.mxu0 %v5535_v58  ;;  %v4695_v37 = vcombine.low %v430_v23, %v434_v24  ;;  %v486_v23 = vld [vmem:[#allocation5 + $0xb90] sm:$0xff] }
 0x14a   :  { %2975 = vmatprep.subr.bf16.mxu0 %v4648_v39  ;;  %v4704_v39 = vcombine.high %v438_v32, %v442_v34  ;;  %v490_v24 = vld [vmem:[#allocation5 + $0xbb0] sm:$0xff] }
 0x14b   :  { %2781 = vmatpush1.bf16.msra.mxu1 %v4557_v45  ;;  %v4613_v45 = vcombine.low %v349_v30, %v353_v31  ;;  %v405_v30 = vld [vmem:[#allocation5 + $0x908] sm:$0xff] }
 0x14c   :  { %2782 = vmatprep.subr.bf16.mxu1 %v4566_v47  ;;  %v4622_v47 = vcombine.high %v357_v40, %v361_v41  ;;  %v409_v31 = vld [vmem:[#allocation5 + $0x928] sm:$0xff] }
 0x14d   :  { %2976 = vmatpush1.bf16.msra.mxu0 %v4647_v46  ;;  %v4703_v46 = vcombine.low %v438_v32, %v442_v34  ;;  %v494_v32 = vld [vmem:[#allocation5 + $0xbd0] sm:$0xff] }
 0x14e   :  { %2977 = vmatprep.subr.bf16.mxu0 %v4656_v48  ;;  %v4712_v48 = vcombine.high %v446_v42, %v450_v43  ;;  %v498_v34 = vld [vmem:[#allocation5 + $0xbf0] sm:$0xff] }
 0x14f   :  { %2783 = vmatpush1.bf16.msra.mxu1 %v4565_v53  ;;  %v4621_v53 = vcombine.low %v357_v40, %v361_v41  ;;  %v413_v40 = vld [vmem:[#allocation5 + $0x948] sm:$0xff] }
 0x150   :  { %2784 = vmatprep.subr.bf16.mxu1 %v4574_v55  ;;  %v4630_v55 = vcombine.high %v365_v49, %v369_v50  ;;  %v417_v41 = vld [vmem:[#allocation5 + $0x968] sm:$0xff] }
 0x151   :  { %2978 = vmatpush1.bf16.msra.mxu0 %v4655_v54  ;;  %v4711_v54 = vcombine.low %v446_v42, %v450_v43  ;;  %v502_v42 = vld [vmem:[#allocation5 + $0xc10] sm:$0xff] }
 0x152   :  { %2979 = vmatprep.subr.bf16.mxu0 %v4664_v56  ;;  %v4720_v56 = vcombine.high %v454_v51, %v458_v52  ;;  %v506_v43 = vld [vmem:[#allocation5 + $0xc30] sm:$0xff] }
 0x153   :  { %2785 = vmatpush1.bf16.msra.mxu1 %v4573_v63  ;;  %v4629_v63 = vcombine.low %v365_v49, %v369_v50  ;;  %v421_v49 = vld [vmem:[#allocation5 + $0x988] sm:$0xff] }
 0x154   :  { %2786 = vmatprep.subr.bf16.mxu1 %v4582_v1  ;;  %v4638_v1 = vcombine.high %v373_v57, %v377_v60  ;;  %v425_v50 = vld [vmem:[#allocation5 + $0x9a8] sm:$0xff] }
 0x155   :  { %2980 = vmatpush1.bf16.msra.mxu0 %v4663_v0  ;;  %v4719_v0 = vcombine.low %v454_v51, %v458_v52  ;;  %v510_v51 = vld [vmem:[#allocation5 + $0xc50] sm:$0xff]  ;;  %v4677_v52 = vcombine.low %v413_v40, %v417_v41 }
 0x156   :  { %2981 = vmatprep.subr.bf16.mxu0 %v4672_v2  ;;  %v4728_v2 = vcombine.high %v462_v61, %v466_v62 }
 0x157   :  { %2787 = vmatpush1.bf16.msra.mxu1 %v4581_v7  ;;  %v4637_v7 = vcombine.low %v373_v57, %v377_v60  ;;  %v429_v57 = vld [vmem:[#allocation5 + $0x9c8] sm:$0xff] }
 0x158   :  { %2788 = vmatprep.subr.bf16.mxu1 %v4590_v9  ;;  %v4646_v9 = vcombine.high %v381_v3, %v385_v4  ;;  %v433_v60 = vld [vmem:[#allocation5 + $0x9e8] sm:$0xff] }
 0x159   :  { %2982 = vmatpush1.bf16.msra.mxu0 %v4671_v8  ;;  %v4727_v8 = vcombine.low %v462_v61, %v466_v62  ;;  %v503_v61 = vld [vmem:[#allocation5 + $0xc18] sm:$0xff] }
 0x15a   :  { %2983 = vmatprep.subr.bf16.mxu0 %v4680_v10  ;;  %v4736_v10 = vcombine.high %v470_v5, %v474_v6  ;;  %v507_v62 = vld [vmem:[#allocation5 + $0xc38] sm:$0xff] }
 0x15b   :  { %2789 = vmatpush1.bf16.msra.mxu1 %v4589_v15  ;;  %v4645_v15 = vcombine.low %v381_v3, %v385_v4  ;;  %v437_v3 = vld [vmem:[#allocation5 + $0xa08] sm:$0xff] }
 0x15c   :  { %2790 = vmatprep.subr.bf16.mxu1 %v4598_v18  ;;  %v4654_v18 = vcombine.high %v389_v11, %v393_v12  ;;  %v441_v4 = vld [vmem:[#allocation5 + $0xa28] sm:$0xff] }
 0x15d   :  { %2984 = vmatpush1.bf16.msra.mxu0 %v4679_v17  ;;  %v4735_v17 = vcombine.low %v470_v5, %v474_v6  ;;  %v4693_v5 = vcombine.low %v429_v57, %v433_v60  ;;  %v4702_v6 = vcombine.high %v437_v3, %v441_v4 }
 0x15e   :  { %2985 = vmatprep.subr.bf16.mxu0 %v4688_v20  ;;  %v4744_v20 = vcombine.high %v478_v13, %v482_v14 }
 0x15f   :  { %2791 = vmatpush1.bf16.msra.mxu1 %v4597_v25  ;;  %v4653_v25 = vcombine.low %v389_v11, %v393_v12  ;;  %v4769_v11 = vcombine.low %v503_v61, %v507_v62 }
 0x160   :  { %2792 = vmatprep.subr.bf16.mxu1 %v4606_v27  ;;  %v4662_v27 = vcombine.high %v397_v21, %v401_v22 }
 0x161   :  { %2986 = vmatpush1.bf16.msra.mxu0 %v4687_v26  ;;  %v4743_v26 = vcombine.low %v478_v13, %v482_v14 }
 0x162   :  { %2987 = vmatprep.subr.bf16.mxu0 %v4696_v28  ;;  %v4752_v28 = vcombine.high %v486_v23, %v490_v24 }
 0x163   :  { %2793 = vmatpush1.bf16.msra.mxu1 %v4605_v36  ;;  %v4661_v36 = vcombine.low %v397_v21, %v401_v22 }
 0x164   :  { %2794 = vmatprep.subr.bf16.mxu1 %v4614_v38  ;;  %v4670_v38 = vcombine.high %v405_v30, %v409_v31 }
 0x165   :  { %2988 = vmatpush1.bf16.msra.mxu0 %v4695_v37  ;;  %v4751_v37 = vcombine.low %v486_v23, %v490_v24 }
 0x166   :  { %2989 = vmatprep.subr.bf16.mxu0 %v4704_v39  ;;  %v4760_v39 = vcombine.high %v494_v32, %v498_v34 }
 0x167   :  { %2795 = vmatpush1.bf16.msra.mxu1 %v4613_v45  ;;  %v4669_v45 = vcombine.low %v405_v30, %v409_v31  ;;  %v5038_v31 = vld [vmem:[#allocation8] ss:$8 sps:$4 sm:$0xff]  }
 0x168   :  { %2796 = vmatprep.subr.bf16.mxu1 %v4622_v47  ;;  %v4678_v47 = vcombine.high %v413_v40, %v417_v41  ;;  %v5046_v40 = vld [vmem:[#allocation8 + $0x24] ss:$8 sps:$4 sm:$0xff]  }
 0x169   :  { %2990 = vmatpush1.bf16.msra.mxu0 %v4703_v46  ;;  %v4759_v46 = vcombine.low %v494_v32, %v498_v34  ;;  %v5043_v34 = vld [vmem:[#allocation8 + $0x14] ss:$8 sps:$4 sm:$0xff]   ;;  %v477_v41 = vld [vmem:[#allocation5 + $0xb48] sm:$0xff] }
 0x16a   :  { %2991 = vmatprep.subr.bf16.mxu0 %v4712_v48  ;;  %v4768_v48 = vcombine.high %v502_v42, %v506_v43 }
 0x16b   :  { %2797 = vmatpush1.bf16.msra.mxu1 %v4621_v53  ;;  %v4767_v53 = vcombine.low %v502_v42, %v506_v43  ;;  %v481_v42 = vld [vmem:[#allocation5 + $0xb68] sm:$0xff] }
 0x16c   :  { %2798 = vmatprep.subr.bf16.mxu1 %v4630_v55  ;;  %v4776_v55 = vcombine.high %v510_v51, %v510_v51 }
 0x16d   :  { %2992 = vmatpush1.bf16.msra.mxu0 %v4711_v54  ;;  %v4686_v54 = vcombine.high %v421_v49, %v425_v50 }
 0x16e   :  { %2993 = vmatprep.subr.bf16.mxu0 %v4720_v56  ;;  %v4775_v56 = vcombine.low %v510_v51, %v510_v51 }
 0x16f   :  { %2799 = vmatpush1.bf16.msra.mxu1 %v4629_v63  ;;  %v4685_v63 = vcombine.low %v421_v49, %v425_v50  ;;  %v4741_v49 = vcombine.low %v477_v41, %v481_v42  ;;  %v5047_v50 = vld [vmem:[#allocation8 + $0x30] ss:$8 sps:$4 sm:$0xff]  }
 0x170   :  { %2809 = vmatprep.subr.bf16.mxu1 %v4638_v1  ;;  %v2552_v1 = vsel %vm2538_vm0, %v4775_v56, 0  ;;  %v5050_v56 = vld [vmem:[#allocation8 + $0x40] ss:$8 sps:$4 sm:$0xff]  }
 0x171   :  { %2994 = vmatpush1.bf16.msra.mxu0 %v4719_v0  ;;  %v4694_v0 = vcombine.high %v429_v57, %v433_v60  ;;  %v5055_v60 = vld [vmem:[#allocation8 + $0x54] ss:$8 sps:$4 sm:$0xff]  }
 0x172   :  { %2995 = vmatprep.subr.bf16.mxu0 %v4728_v2  ;;  %2801 = vmatmul.mubr.bf16.vlgmr.msra.gmra.mrb[4].mxu1 %v5563_v35  ;;  %v4770_v2 = vcombine.high %v503_v61, %v507_v62  ;;  %v119_v61 = vld [vmem:[#allocation5 + $0x18] sm:$0xff] }
 0x173   :  { %2810 = vmatpush1.bf16.msra.mxu1 %v4637_v7  ;;  %2841 = vmatprep.mubr.bf16.mxu1 %v5535_v58  ;;  %v445_v7 = vld [vmem:[#allocation5 + $0xa48] sm:$0xff]  ;;  %v123_v62 = vld [vmem:[#allocation5 + $0x38] sm:$0xff] }
 0x174   :  { %2811 = vmatprep.subr.bf16.mxu1 %v4646_v9  ;;  %v511_v9 = vld [vmem:[#allocation5 + $0xc58] sm:$0xff] }
 0x175   :  { %2996 = vmatpush1.bf16.msra.mxu0 %v4727_v8  ;;  %v449_v8 = vld [vmem:[#allocation5 + $0xa68] sm:$0xff]  ;;  %v4778_v13 = vcombine.high %v511_v9, %v511_v9  ;;  %v4777_v14 = vcombine.low %v511_v9, %v511_v9  ;;  %v135_v9 = vld [vmem:[#allocation5 + $0x98] sm:$0xff] }
 0x176   :  { %2997 = vmatprep.subr.bf16.mxu0 %v4736_v10  ;;  %v4701_v10 = vcombine.low %v437_v3, %v441_v4  ;;  %v4710_v12 = vcombine.high %v445_v7, %v449_v8  ;;  %v127_v3 = vld [vmem:[#allocation5 + $0x58] sm:$0xff] }
 0x177   :  { %2812 = vmatpush1.bf16.msra.mxu1 %v4645_v15  ;;  %v453_v15 = vld [vmem:[#allocation5 + $0xa88] sm:$0xff]  ;;  %v2558_v24 = vsel %vm2538_vm0, %v4777_v14, 0  ;;  %v131_v4 = vld [vmem:[#allocation5 + $0x78] sm:$0xff] }
 0x178   :  { %2813 = vmatprep.subr.bf16.mxu1 %v4654_v18  ;;  %v5064_v14 = vld [vmem:[#allocation8 + $0x84] ss:$8 sps:$4 sm:$0xff]  }
 0x179   :  { %2998 = vmatpush1.bf16.msra.mxu0 %v4735_v17  ;;  %v457_v17 = vld [vmem:[#allocation5 + $0xaa8] sm:$0xff] }
 0x17a   :  { %2999 = vmatprep.subr.bf16.mxu0 %v4744_v20  ;;  %v4709_v20 = vcombine.low %v445_v7, %v449_v8  ;;  %v4718_v22 = vcombine.high %v453_v15, %v457_v17  ;;  %v4717_v30 = vcombine.low %v453_v15, %v457_v17  ;;  %v4394_v7 = vcombine.high %v127_v3, %v131_v4  ;;  %v5061_v8 = vld [vmem:[#allocation8 + $0x74] ss:$8 sps:$4 sm:$0xff]  }
 0x17b   :  { %2814 = vmatpush1.bf16.msra.mxu1 %v4653_v25  ;;  %v5040_v25 = vld [vmem:[#allocation8 + $0x4] ss:$8 sps:$4 sm:$0xff]   ;;  %v143_v15 = vld [vmem:[#allocation5 + $0xd8] sm:$0xff] }
 0x17c   :  { %2815 = vmatprep.subr.bf16.mxu1 %v4662_v27  ;;  %v465_v27 = vld [vmem:[#allocation5 + $0xae8] sm:$0xff]  ;;  %v147_v17 = vld [vmem:[#allocation5 + $0xf8] sm:$0xff] }
 0x17d   :  { %3000 = vmatpush1.bf16.msra.mxu0 %v4743_v26  ;;  %v461_v26 = vld [vmem:[#allocation5 + $0xac8] sm:$0xff] }
 0x17e   :  { %3001 = vmatprep.subr.bf16.mxu0 %v4752_v28  ;;  %v4726_v32 = vcombine.high %v461_v26, %v465_v27 }
 0x17f   :  { %2816 = vmatpush1.bf16.msra.mxu1 %v4661_v36  ;;  %v469_v36 = vld [vmem:[#allocation5 + $0xb08] sm:$0xff] }
 0x180   :  { %2817 = vmatprep.subr.bf16.mxu1 %v4670_v38  ;;  %v4725_v38 = vcombine.low %v461_v26, %v465_v27  ;;  %v151_v27 = vld [vmem:[#allocation5 + $0x118] sm:$0xff] }
 0x181   :  { %3002 = vmatpush1.bf16.msra.mxu0 %v4751_v37  ;;  %v473_v37 = vld [vmem:[#allocation5 + $0xb28] sm:$0xff] }
 0x182   :  { %3003 = vmatprep.subr.bf16.mxu0 %v4760_v39  ;;  %v4734_v39 = vcombine.high %v469_v36, %v473_v37  ;;  %v4733_v43 = vcombine.low %v469_v36, %v473_v37  ;;  %v5065_v36 = vld [vmem:[#allocation8 + $0x90] ss:$8 sps:$4 sm:$0xff]  }
 0x183   :  { %2818 = vmatpush1.bf16.msra.mxu1 %v4669_v45  ;;  %v5044_v45 = vld [vmem:[#allocation8 + $0x20] ss:$8 sps:$4 sm:$0xff]  }
 0x184   :  { %2819 = vmatprep.subr.bf16.mxu1 %v4678_v47  ;;  %v5049_v47 = vld [vmem:[#allocation8 + $0x34] ss:$8 sps:$4 sm:$0xff]  }
 0x185   :  { %3004 = vmatpush1.bf16.msra.mxu0 %v4759_v46  ;;  %v4742_v46 = vcombine.high %v477_v41, %v481_v42  ;;  %v5599_v42 = vld [vmem:[#allocation7] sm:$0xff] }
 0x186   :  { %3014 = vmatprep.subr.bf16.mxu0 %v4768_v48  ;;  %v485_v48 = vld [vmem:[#allocation5 + $0xb88] sm:$0xff] }
 0x187   :  { %2820 = vmatpush1.bf16.msra.mxu1 %v4677_v52  ;;  %v5052_v52 = vld [vmem:[#allocation8 + $0x44] ss:$8 sps:$4 sm:$0xff]  }
 0x188   :  { %3006 = vmatmul.mubr.bf16.vlgmr.msra.gmra.mrb[8].mxu0 %v5543_v19  ;;  %2821 = vmatprep.subr.bf16.mxu1 %v4686_v54  ;;  %v497_v54 = vld [vmem:[#allocation5 + $0xbe8] sm:$0xff] }
 0x189   :  { %3015 = vmatpush1.bf16.msra.mxu0 %v4767_v53  ;;  %3046 = vmatprep.mubr.bf16.mxu0 %v5421_v33  ;;  %v493_v53 = vld [vmem:[#allocation5 + $0xbc8] sm:$0xff] }
 0x18a   :  { %4783 = vmatprep.subr.msk.bf16.mxu0 %vm2538_vm0, %v4776_v55  ;;  %v4758_v57 = vcombine.high %v493_v53, %v497_v54 }
 0x18b   :  { %2822 = vmatpush1.bf16.msra.mxu1 %v4685_v63  ;;  %v4757_v63 = vcombine.low %v493_v53, %v497_v54 }
 0x18c   :  { %2823 = vmatprep.subr.bf16.mxu1 %v4694_v0  ;;  %v5053_v0 = vld [vmem:[#allocation8 + $0x50] ss:$8 sps:$4 sm:$0xff]  }
 0x18d   :  { %3017 = vmatpush1.bf16.msra.mxu0 %v2552_v1  ;;  %v4386_v1 = vcombine.high %v119_v61, %v123_v62 }
 0x18e   :  { %3178 = vmatprep.subr.bf16.mxu0 %v4770_v2  ;;  %v5058_v2 = vld [vmem:[#allocation8 + $0x64] ss:$8 sps:$4 sm:$0xff]  }
 0x18f   :  { %2824 = vmatpush1.bf16.msra.mxu1 %v4693_v5  ;;  %v4385_v5 = vcombine.low %v119_v61, %v123_v62 }
 0x190   :  { %2825 = vmatprep.subr.bf16.mxu1 %v4702_v6  ;;  %v5056_v6 = vld [vmem:[#allocation8 + $0x60] ss:$8 sps:$4 sm:$0xff]  }
 0x193   :  { %v5579_v18 = vpop.f32.mrb[0].mxu0  ;;  %2826 = vmatpush1.bf16.msra.mxu1 %v4701_v10  ;;  %v139_v10 = vld [vmem:[#allocation5 + $0xb8] sm:$0xff] }
 0x194   :  { %4784 = vmatmul.mubr.msk.bf16.vlgmr.msra.gmra.mrb[8].mxu0 %vm2534_vm1, %v5553_v44  ;;  %v5583_v21 = vpop.f32.mrb[1].mxu0  ;;  %2827 = vmatprep.subr.bf16.mxu1 %v4710_v12  ;;  %v5059_v12 = vld [vmem:[#allocation8 + $0x70] ss:$8 sps:$4 sm:$0xff]  }
 0x195   :  { %3179 = vmatpush1.bf16.msra.mxu0 %v4769_v11  ;;  %v2724_v23 = vpop.f32.mrb[2].mxu0  ;;  %3210 = vmatprep.mubr.bf16.mxu0 %v5421_v33  ;;  %v5041_v33 = vld [vmem:[#allocation8 + $0x10] ss:$8 sps:$4 sm:$0xff]   ;;  %v4393_v11 = vcombine.low %v127_v3, %v131_v4  ;;  %v5074_v3 = vld [vmem:[#allocation8 + $0xc0] ss:$8 sps:$4 sm:$0xff]  }
 0x196   :  { %4785 = vmatprep.subr.msk.bf16.mxu0 %vm2538_vm0, %v4778_v13  ;;  %v2725_v28 = vpop.f32.mrb[3].mxu0  ;;  %v4402_v13 = vcombine.high %v135_v9, %v139_v10 }
 0x197   :  { %2828 = vmatpush1.bf16.msra.mxu1 %v4709_v20  ;;  %v514_v20 = vlaneseq  ;;  %v155_v28 = vld [vmem:[#allocation5 + $0x138] sm:$0xff] }
 0x198   :  { %2829 = vmatprep.subr.bf16.mxu1 %v4718_v22  ;;  %v4401_v22 = vcombine.low %v135_v9, %v139_v10  ;;  %v4418_v37 = vcombine.high %v151_v27, %v155_v28  ;;  %v4417_v41 = vcombine.low %v151_v27, %v155_v28  ;;  %v5083_v27 = vld [vmem:[#allocation8 + $0xf0] ss:$8 sps:$4 sm:$0xff]  }
 0x199   :  { %3181 = vmatpush1.bf16.msra.mxu0 %v2558_v24  ;;  %v5062_v24 = vld [vmem:[#allocation8 + $0x80] ss:$8 sps:$4 sm:$0xff]  }
 0x19a   :  { %4015 = vmatprep.subr.bf16.mxu0 %v5040_v25  ;;  %v4410_v25 = vcombine.high %v143_v15, %v147_v17 }
 0x19b   :  { %2830 = vmatpush1.bf16.msra.mxu1 %v4717_v30  ;;  %v5592_v23 = vpop.f32.mrb[4].mxu0 }
 0x19c   :  { %4786 = vmatmul.mubr.msk.bf16.vlgmr.msra.gmra.mrb[12].mxu0 %vm2534_vm1, %v5553_v44  ;;  %2831 = vmatprep.subr.bf16.mxu1 %v4726_v32  ;;  %v489_v44 = vld [vmem:[#allocation5 + $0xba8] sm:$0xff]  ;;  %v5594_v26 = vpop.f32.mrb[5].mxu0 }
 0x19d   :  { %4016 = vmatpush1.bf16.msra.mxu0 %v5038_v31  ;;  %v4750_v51 = vcombine.high %v485_v48, %v489_v44  ;;  %v4749_v55 = vcombine.low %v485_v48, %v489_v44  ;;  %v2888_v30 = vpop.f32.mrb[6].mxu0  ;;  %v5596_v31 = vshrl.u32 %v514_v20, 7  ;;  %v167_v48 = vld [vmem:[#allocation5 + $0x198] sm:$0xff] }
 0x19e   :  { %4017 = vmatprep.subr.bf16.mxu0 %v5043_v34  ;;  %v2889_v32 = vpop.f32.mrb[7].mxu0  ;;  %v4409_v34 = vcombine.low %v143_v15, %v147_v17  ;;  %v171_v44 = vld [vmem:[#allocation5 + $0x1b8] sm:$0xff] }
 0x19f   :  { %2832 = vmatpush1.bf16.msra.mxu1 %v4725_v38  ;;  %v5070_v38 = vld [vmem:[#allocation8 + $0xa4] ss:$8 sps:$4 sm:$0xff]   ;;  %v4434_v53 = vcombine.high %v167_v48, %v171_v44  ;;  %v195_v15 = vld [vmem:[#allocation5 + $0x278] sm:$0xff] }
 0x1a0   :  { %2833 = vmatprep.subr.bf16.mxu1 %v4734_v39  ;;  %v163_v39 = vld [vmem:[#allocation5 + $0x178] sm:$0xff] }
 0x1a1   :  { %4018 = vmatpush1.bf16.msra.mxu0 %v5041_v33  ;;  %v159_v33 = vld [vmem:[#allocation5 + $0x158] sm:$0xff] }
 0x1a2   :  { %4019 = vmatprep.subr.bf16.mxu0 %v5046_v40  ;;  %v516_v40 = vsub.s32 0, %v5596_v31  ;;  %v207_v32 = vld [vmem:[#allocation5 + $0x2d8] sm:$0xff] }
 0x1a3   :  { %2834 = vmatpush1.bf16.msra.mxu1 %v4733_v43  ;;  %v520_v43 = vsub.s32 1, %v5596_v31 }
 0x1a4   :  { %2835 = vmatprep.subr.bf16.mxu1 %v4742_v46  ;;  %v4426_v46 = vcombine.high %v159_v33, %v163_v39 }
 0x1a5   :  { %4020 = vmatpush1.bf16.msra.mxu0 %v5044_v45  ;;  %v5068_v45 = vld [vmem:[#allocation8 + $0xa0] ss:$8 sps:$4 sm:$0xff]  }
 0x1a6   :  { %4021 = vmatprep.subr.bf16.mxu0 %v5049_v47  ;;  %v5073_v47 = vld [vmem:[#allocation8 + $0xb4] ss:$8 sps:$4 sm:$0xff]  }
 0x1a7   :  { %2836 = vmatpush1.bf16.msra.mxu1 %v4741_v49  ;;  %v517_v49 = vrot.slane %v5599_v42, %v516_v40 }
 0x1a8   :  { %2837 = vmatprep.subr.bf16.mxu1 %v4750_v51  ;;  %v4425_v51 = vcombine.low %v159_v33, %v163_v39  ;;  %v5086_v33 = vld [vmem:[#allocation8 + $0x100] ss:$8 sps:$4 sm:$0xff]  }
 0x1a9   :  { %4022 = vmatpush1.bf16.msra.mxu0 %v5047_v50  ;;  %v521_v50 = vrot.slane %v5599_v42, %v520_v43 }
 0x1aa   :  { %4023 = vmatprep.subr.bf16.mxu0 %v5052_v52  ;;  %v5071_v52 = vld [vmem:[#allocation8 + $0xb0] ss:$8 sps:$4 sm:$0xff]  }
 0x1ab   :  { %2838 = vmatpush1.bf16.msra.mxu1 %v4749_v55  ;;  %v5076_v55 = vld [vmem:[#allocation8 + $0xc4] ss:$8 sps:$4 sm:$0xff]  }
 0x1ac   :  { %2839 = vmatprep.subr.bf16.mxu1 %v4758_v57  ;;  %v179_v57 = vld [vmem:[#allocation5 + $0x1f8] sm:$0xff] }
 0x1ad   :  { %4024 = vmatpush1.bf16.msra.mxu0 %v5050_v56  ;;  %v175_v56 = vld [vmem:[#allocation5 + $0x1d8] sm:$0xff] }
 0x1ae   :  { %4025 = vmatprep.subr.bf16.mxu0 %v5055_v60  ;;  %v4442_v4 = vcombine.high %v175_v56, %v179_v57  ;;  %v4441_v10 = vcombine.low %v175_v56, %v179_v57  ;;  %v235_v56 = vld [vmem:[#allocation5 + $0x3b8] sm:$0xff] }
 0x1af   :  { %2840 = vmatpush1.bf16.msra.mxu1 %v4757_v63  ;;  %v5097_v57 = vld [vmem:[#allocation8 + $0x134] ss:$8 sps:$4 sm:$0xff]  }
 0x1b0   :  { %3055 = vmatprep.subr.bf16.mxu1 %v4386_v1 }
 0x1b1   :  { %4026 = vmatpush1.bf16.msra.mxu0 %v5053_v0  ;;  %v4433_v0 = vcombine.low %v167_v48, %v171_v44  ;;  %v5089_v44 = vld [vmem:[#allocation8 + $0x110] ss:$8 sps:$4 sm:$0xff]  }
 0x1b2   :  { %4027 = vmatprep.subr.bf16.mxu0 %v5058_v2  ;;  %2842 = vmatmul.mubr.bf16.vlgmr.msra.gmra.mrb[4].mxu1 %v5543_v19 }
 0x1b3   :  { %3056 = vmatpush1.bf16.msra.mxu1 %v4385_v5  ;;  %3087 = vmatprep.mubr.bf16.mxu1 %v5537_v59  ;;  %v5067_v59 = vld [vmem:[#allocation8 + $0x94] ss:$8 sps:$4 sm:$0xff]  }
 0x1b4   :  { %3057 = vmatprep.subr.bf16.mxu1 %v4394_v7  ;;  %v183_v7 = vld [vmem:[#allocation5 + $0x218] sm:$0xff] }
 0x1b5   :  { %4028 = vmatpush1.bf16.msra.mxu0 %v5056_v6  ;;  %v5079_v6 = vld [vmem:[#allocation8 + $0xd4] ss:$8 sps:$4 sm:$0xff]  }
 0x1b6   :  { %4029 = vmatprep.subr.bf16.mxu0 %v5061_v8  ;;  %v187_v8 = vld [vmem:[#allocation5 + $0x238] sm:$0xff] }
 0x1b7   :  { %3058 = vmatpush1.bf16.msra.mxu1 %v4393_v11  ;;  %v5077_v11 = vld [vmem:[#allocation8 + $0xd0] ss:$8 sps:$4 sm:$0xff]   ;;  %v4449_v17 = vcombine.low %v183_v7, %v187_v8 }
 0x1b8   :  { %3059 = vmatprep.subr.bf16.mxu1 %v4402_v13 }
 0x1b9   :  { %4030 = vmatpush1.bf16.msra.mxu0 %v5059_v12  ;;  %v4450_v12 = vcombine.high %v183_v7, %v187_v8  ;;  %v5103_v7 = vld [vmem:[#allocation8 + $0x154] ss:$8 sps:$4 sm:$0xff]  }
 0x1ba   :  { %4031 = vmatprep.subr.bf16.mxu0 %v5064_v14  ;;  %v191_v14 = vld [vmem:[#allocation5 + $0x258] sm:$0xff] }
 0x1bb   :  { %3060 = vmatpush1.bf16.msra.mxu1 %v4401_v22  ;;  %v4458_v20 = vcombine.high %v191_v14, %v195_v15  ;;  %v5085_v22 = vld [vmem:[#allocation8 + $0xf4] ss:$8 sps:$4 sm:$0xff]  }
 0x1bc   :  { %3061 = vmatprep.subr.bf16.mxu1 %v4410_v25  ;;  %v203_v25 = vld [vmem:[#allocation5 + $0x2b8] sm:$0xff] }
 0x1bd   :  { %4032 = vmatpush1.bf16.msra.mxu0 %v5062_v24  ;;  %v199_v24 = vld [vmem:[#allocation5 + $0x298] sm:$0xff] }
 0x1be   :  { %4033 = vmatprep.subr.bf16.mxu0 %v5067_v59  ;;  %v4457_v59 = vcombine.low %v191_v14, %v195_v15  ;;  %v4466_v28 = vcombine.high %v199_v24, %v203_v25  ;;  %v5104_v15 = vld [vmem:[#allocation8 + $0x160] ss:$8 sps:$4 sm:$0xff]  }
 0x1bf   :  { %3062 = vmatpush1.bf16.msra.mxu1 %v4409_v34  ;;  %v211_v34 = vld [vmem:[#allocation5 + $0x2f8] sm:$0xff] }
 0x1c0   :  { %3063 = vmatprep.subr.bf16.mxu1 %v4418_v37  ;;  %v4465_v37 = vcombine.low %v199_v24, %v203_v25  ;;  %v5107_v25 = vld [vmem:[#allocation8 + $0x170] ss:$8 sps:$4 sm:$0xff]  }
 0x1c1   :  { %4034 = vmatpush1.bf16.msra.mxu0 %v5065_v36  ;;  %v5088_v36 = vld [vmem:[#allocation8 + $0x104] ss:$8 sps:$4 sm:$0xff]  }
 0x1c2   :  { %4035 = vmatprep.subr.bf16.mxu0 %v5070_v38  ;;  %v4474_v38 = vcombine.high %v207_v32, %v211_v34 }
 0x1c3   :  { %3064 = vmatpush1.bf16.msra.mxu1 %v4417_v41  ;;  %v215_v41 = vld [vmem:[#allocation5 + $0x318] sm:$0xff] }
 0x1c4   :  { %3065 = vmatprep.subr.bf16.mxu1 %v4426_v46  ;;  %v5091_v46 = vld [vmem:[#allocation8 + $0x114] ss:$8 sps:$4 sm:$0xff]  }
 0x1c5   :  { %4036 = vmatpush1.bf16.msra.mxu0 %v5068_v45  ;;  %v2638_v54 = vpop.f32.mrb[0].mxu1  ;;  %v219_v45 = vld [vmem:[#allocation5 + $0x338] sm:$0xff] }
 0x1c6   :  { %4037 = vmatprep.subr.bf16.mxu0 %v5073_v47  ;;  %v4954_v60 = vadd.f32 %v2638_v54, %v517_v49  ;;  %v2640_v61 = vpop.f32.mrb[1].mxu1  ;;  %v4473_v47 = vcombine.low %v207_v32, %v211_v34  ;;  %v4482_v48 = vcombine.high %v215_v41, %v219_v45  ;;  %v223_v49 = vld [vmem:[#allocation5 + $0x358] sm:$0xff]  ;;  %v5092_v54 = vld [vmem:[#allocation8 + $0x120] ss:$8 sps:$4 sm:$0xff]  }
 0x1c7   :  { %v4956_v62 = vadd.f32 %v2640_v61, %v521_v50  ;;  %v2642_v63 = vpop.f32.mrb[2].mxu1  ;;  %3066 = vmatpush1.bf16.msra.mxu1 %v4425_v51  ;;  %v227_v50 = vld [vmem:[#allocation5 + $0x378] sm:$0xff]  ;;  %v5094_v51 = vld [vmem:[#allocation8 + $0x124] ss:$8 sps:$4 sm:$0xff]   ;;  %v5110_v34 = vld [vmem:[#allocation8 + $0x180] ss:$8 sps:$4 sm:$0xff]  }
 0x1c8   :  { %v4955_v1 = vadd.f32 %v4954_v60, %v5579_v18  ;;  %v2643_v2 = vpop.f32.mrb[3].mxu1  ;;  %3067 = vmatprep.subr.bf16.mxu1 %v4434_v53  ;;  %v5082_v18 = vld [vmem:[#allocation8 + $0xe4] ss:$8 sps:$4 sm:$0xff]   ;;  %v4490_v53 = vcombine.high %v223_v49, %v227_v50  ;;  %v4489_v60 = vcombine.low %v223_v49, %v227_v50  ;;  %v239_v63 = vld [vmem:[#allocation5 + $0x3d8] sm:$0xff] }
 0x1c9   :  { %4038 = vmatpush1.bf16.msra.mxu0 %v5071_v52  ;;  %v4957_v5 = vadd.f32 %v4956_v62, %v5583_v21  ;;  %v5080_v21 = vld [vmem:[#allocation8 + $0xe0] ss:$8 sps:$4 sm:$0xff]   ;;  %v4481_v52 = vcombine.low %v215_v41, %v219_v45  ;;  %v5095_v62 = vld [vmem:[#allocation8 + $0x130] ss:$8 sps:$4 sm:$0xff]   ;;  %v5118_v45 = vld [vmem:[#allocation8 + $0x1a4] ss:$8 sps:$4 sm:$0xff]  }
 0x1ca   :  { %4039 = vmatprep.subr.bf16.mxu0 %v5076_v55  ;;  %v3219_v30 = vmax.f32 %v4955_v1, 0.0  ;;  %v231_v55 = vld [vmem:[#allocation5 + $0x398] sm:$0xff]  ;;  %v5100_v1 = vld [vmem:[#allocation8 + $0x144] ss:$8 sps:$4 sm:$0xff]  }
 0x1cb   :  { %v3220_v9 = vmax.f32 %v4957_v5, 0.0  ;;  %3068 = vmatpush1.bf16.msra.mxu1 %v4433_v0  ;;  %v4498_v61 = vcombine.high %v231_v55, %v235_v56  ;;  %v243_v0 = vld [vmem:[#allocation5 + $0x3f8] sm:$0xff]  ;;  %v4497_v2 = vcombine.low %v231_v55, %v235_v56  ;;  %v5124_v56 = vld [vmem:[#allocation8 + $0x1c4] ss:$8 sps:$4 sm:$0xff]  }
 0x1cc   :  { %3069 = vmatprep.subr.bf16.mxu1 %v4442_v4  ;;  %v3227_v39 = vpack.c.bf16 %v3219_v30, %v3219_v30  ;;  %v5098_v4 = vld [vmem:[#allocation8 + $0x140] ss:$8 sps:$4 sm:$0xff]   ;;  %v247_v5 = vld [vmem:[#allocation5 + $0x418] sm:$0xff]  ;;  %v4505_v8 = vcombine.low %v239_v63, %v243_v0 }
 0x1cd   :  { %4040 = vmatpush1.bf16.msra.mxu0 %v5074_v3  ;;  %v3228_v13 = vpack.c.bf16 %v3220_v9, %v3220_v9  ;;  %v4506_v3 = vcombine.high %v239_v63, %v243_v0  ;;  %v291_v41 = vld [vmem:[#allocation5 + $0x578] sm:$0xff] }
 0x1ce   :  { %4041 = vmatprep.subr.bf16.mxu0 %v5079_v6  ;;  %v251_v6 = vld [vmem:[#allocation5 + $0x438] sm:$0xff] }
 0x1cf   :  { %3070 = vmatpush1.bf16.msra.mxu1 %v4441_v10  ;;  %4047 = vmatprep.mubr.bf16.mxu0 %v3228_v13  ;;  %v4514_v9 = vcombine.high %v247_v5, %v251_v6  ;;  %v5101_v10 = vld [vmem:[#allocation8 + $0x150] ss:$8 sps:$4 sm:$0xff]   ;;  %v5106_v13 = vld [vmem:[#allocation8 + $0x164] ss:$8 sps:$4 sm:$0xff]   ;;  %v5121_v50 = vld [vmem:[#allocation8 + $0x1b4] ss:$8 sps:$4 sm:$0xff]  }
 0x1d0   :  { %3071 = vmatprep.subr.bf16.mxu1 %v4450_v12  ;;  %v259_v12 = vld [vmem:[#allocation5 + $0x478] sm:$0xff] }
 0x1d1   :  { %4042 = vmatpush1.bf16.msra.mxu0 %v5077_v11  ;;  %v255_v11 = vld [vmem:[#allocation5 + $0x458] sm:$0xff] }
 0x1d2   :  { %4043 = vmatprep.subr.bf16.mxu0 %v5082_v18  ;;  %v4513_v18 = vcombine.low %v247_v5, %v251_v6  ;;  %v4522_v14 = vcombine.high %v255_v11, %v259_v12  ;;  %v299_v49 = vld [vmem:[#allocation5 + $0x5b8] sm:$0xff]  ;;  %v5130_v6 = vld [vmem:[#allocation8 + $0x1e4] ss:$8 sps:$4 sm:$0xff]  }
 0x1d3   :  { %3072 = vmatpush1.bf16.msra.mxu1 %v4449_v17  ;;  %v263_v17 = vld [vmem:[#allocation5 + $0x498] sm:$0xff] }
 0x1d4   :  { %3073 = vmatprep.subr.bf16.mxu1 %v4458_v20  ;;  %v5109_v20 = vld [vmem:[#allocation8 + $0x174] ss:$8 sps:$4 sm:$0xff]  }
 0x1d5   :  { %4044 = vmatpush1.bf16.msra.mxu0 %v5080_v21  ;;  %v267_v21 = vld [vmem:[#allocation5 + $0x4b8] sm:$0xff] }
 0x1d6   :  { %4045 = vmatprep.subr.bf16.mxu0 %v5085_v22  ;;  %v4521_v22 = vcombine.low %v255_v11, %v259_v12  ;;  %v4530_v24 = vcombine.high %v263_v17, %v267_v21  ;;  %v4529_v30 = vcombine.low %v263_v17, %v267_v21  ;;  %v307_v55 = vld [vmem:[#allocation5 + $0x5f8] sm:$0xff]  ;;  %v5136_v21 = vld [vmem:[#allocation8 + $0x204] ss:$8 sps:$4 sm:$0xff]  }
 0x1d7   :  { %3074 = vmatpush1.bf16.msra.mxu1 %v4457_v59  ;;  %v271_v59 = vld [vmem:[#allocation5 + $0x4d8] sm:$0xff] }
 0x1d8   :  { %3075 = vmatprep.subr.bf16.mxu1 %v4466_v28  ;;  %v5112_v28 = vld [vmem:[#allocation8 + $0x184] ss:$8 sps:$4 sm:$0xff]   ;;  %v315_v63 = vld [vmem:[#allocation5 + $0x638] sm:$0xff] }
 0x1d9   :  { %4046 = vmatpush1.bf16.msra.mxu0 %v5083_v27  ;;  %v275_v27 = vld [vmem:[#allocation5 + $0x4f8] sm:$0xff] }
 0x1da   :  { %4056 = vmatprep.subr.bf16.mxu0 %v5088_v36  ;;  %v4538_v32 = vcombine.high %v271_v59, %v275_v27  ;;  %v279_v36 = vld [vmem:[#allocation5 + $0x518] sm:$0xff] }
 0x1db   :  { %3076 = vmatpush1.bf16.msra.mxu1 %v4465_v37  ;;  %v5115_v37 = vld [vmem:[#allocation8 + $0x194] ss:$8 sps:$4 sm:$0xff]  }
 0x1dc   :  { %4048 = vmatmul.mubr.bf16.vlgmr.msra.gmra.mrb[16].mxu0 %v3227_v39  ;;  %3077 = vmatprep.subr.bf16.mxu1 %v4474_v38  ;;  %v287_v39 = vld [vmem:[#allocation5 + $0x558] sm:$0xff] }
 0x1dd   :  { %4057 = vmatpush1.bf16.msra.mxu0 %v5086_v33  ;;  %v5113_v33 = vld [vmem:[#allocation8 + $0x190] ss:$8 sps:$4 sm:$0xff]   ;;  %v5127_v0 = vld [vmem:[#allocation8 + $0x1d4] ss:$8 sps:$4 sm:$0xff]  }
 0x1de   :  { %4058 = vmatprep.subr.bf16.mxu0 %v5091_v46  ;;  %v323_v5 = vld [vmem:[#allocation5 + $0x678] sm:$0xff] }
 0x1df   :  { %3078 = vmatpush1.bf16.msra.mxu1 %v4473_v47  ;;  %v4554_v47 = vcombine.high %v287_v39, %v291_v41  ;;  %v331_v11 = vld [vmem:[#allocation5 + $0x6b8] sm:$0xff] }
 0x1e0   :  { %3079 = vmatprep.subr.bf16.mxu1 %v4482_v48  ;;  %v5116_v48 = vld [vmem:[#allocation8 + $0x1a0] ss:$8 sps:$4 sm:$0xff]   ;;  %v5133_v12 = vld [vmem:[#allocation8 + $0x1f4] ss:$8 sps:$4 sm:$0xff]  }
 0x1e1   :  { %4059 = vmatpush1.bf16.msra.mxu0 %v5089_v44  ;;  %v295_v44 = vld [vmem:[#allocation5 + $0x598] sm:$0xff] }
 0x1e2   :  { %4060 = vmatprep.subr.bf16.mxu0 %v5094_v51  ;;  %v4553_v51 = vcombine.low %v287_v39, %v291_v41  ;;  %v339_v17 = vld [vmem:[#allocation5 + $0x6f8] sm:$0xff] }
 0x1e3   :  { %3080 = vmatpush1.bf16.msra.mxu1 %v4481_v52  ;;  %v4562_v52 = vcombine.high %v295_v44, %v299_v49 }
 0x1e4   :  { %3081 = vmatprep.subr.bf16.mxu1 %v4490_v53  ;;  %v5119_v53 = vld [vmem:[#allocation8 + $0x1b0] ss:$8 sps:$4 sm:$0xff]  }
 0x1e5   :  { %4061 = vmatpush1.bf16.msra.mxu0 %v5092_v54  ;;  %v303_v54 = vld [vmem:[#allocation5 + $0x5d8] sm:$0xff] }
 0x1e6   :  { %4062 = vmatprep.subr.bf16.mxu0 %v5097_v57  ;;  %v4561_v57 = vcombine.low %v295_v44, %v299_v49  ;;  %v383_v44 = vld [vmem:[#allocation5 + $0x858] sm:$0xff] }
 0x1e7   :  { %3082 = vmatpush1.bf16.msra.mxu1 %v4489_v60  ;;  %v4570_v60 = vcombine.high %v303_v54, %v307_v55  ;;  %v387_v49 = vld [vmem:[#allocation5 + $0x878] sm:$0xff] }
 0x1e8   :  { %3083 = vmatprep.subr.bf16.mxu1 %v4498_v61  ;;  %v5122_v61 = vld [vmem:[#allocation8 + $0x1c0] ss:$8 sps:$4 sm:$0xff]  }
 0x1e9   :  { %4063 = vmatpush1.bf16.msra.mxu0 %v5095_v62  ;;  %v311_v62 = vld [vmem:[#allocation5 + $0x618] sm:$0xff] }
 0x1ea   :  { %4064 = vmatprep.subr.bf16.mxu0 %v5100_v1  ;;  %v4569_v1 = vcombine.low %v303_v54, %v307_v55  ;;  %v4649_v54 = vcombine.low %v383_v44, %v387_v49 }
 0x1eb   :  { %3084 = vmatpush1.bf16.msra.mxu1 %v4497_v2  ;;  %v4578_v2 = vcombine.high %v311_v62, %v315_v63 }
 0x1ec   :  { %3085 = vmatprep.subr.bf16.mxu1 %v4506_v3  ;;  %v5125_v3 = vld [vmem:[#allocation8 + $0x1d0] ss:$8 sps:$4 sm:$0xff]  }
 0x1ed   :  { %4065 = vmatpush1.bf16.msra.mxu0 %v5098_v4  ;;  %v319_v4 = vld [vmem:[#allocation5 + $0x658] sm:$0xff] }
 0x1ee   :  { %4066 = vmatprep.subr.bf16.mxu0 %v5103_v7  ;;  %v4577_v7 = vcombine.low %v311_v62, %v315_v63  ;;  %v407_v62 = vld [vmem:[#allocation5 + $0x918] sm:$0xff] }
 0x1ef   :  { %3086 = vmatpush1.bf16.msra.mxu1 %v4505_v8  ;;  %v4586_v8 = vcombine.high %v319_v4, %v323_v5  ;;  %v411_v63 = vld [vmem:[#allocation5 + $0x938] sm:$0xff] }
 0x1f0   :  { %3096 = vmatprep.subr.bf16.mxu1 %v4514_v9  ;;  %v5128_v9 = vld [vmem:[#allocation8 + $0x1e0] ss:$8 sps:$4 sm:$0xff]  }
 0x1f1   :  { %4067 = vmatpush1.bf16.msra.mxu0 %v5101_v10  ;;  %v327_v10 = vld [vmem:[#allocation5 + $0x698] sm:$0xff] }
 0x1f2   :  { %4068 = vmatprep.subr.bf16.mxu0 %v5106_v13  ;;  %3088 = vmatmul.mubr.bf16.vlgmr.msra.gmra.mrb[8].mxu1 %v5541_v16  ;;  %v283_v16 = vld [vmem:[#allocation5 + $0x538] sm:$0xff]  ;;  %v4585_v13 = vcombine.low %v319_v4, %v323_v5 }
 0x1f3   :  { %3097 = vmatpush1.bf16.msra.mxu1 %v4513_v18  ;;  %3128 = vmatprep.mubr.bf16.mxu1 %v5546_v29  ;;  %v4537_v29 = vcombine.low %v271_v59, %v275_v27  ;;  %v4546_v38 = vcombine.high %v279_v36, %v283_v16  ;;  %v4545_v46 = vcombine.low %v279_v36, %v283_v16  ;;  %v359_v36 = vld [vmem:[#allocation5 + $0x798] sm:$0xff] }
 0x1f4   :  { %3098 = vmatprep.subr.bf16.mxu1 %v4522_v14  ;;  %v4594_v18 = vcombine.high %v327_v10, %v331_v11  ;;  %v5131_v14 = vld [vmem:[#allocation8 + $0x1f0] ss:$8 sps:$4 sm:$0xff]  }
 0x1f5   :  { %4069 = vmatpush1.bf16.msra.mxu0 %v5104_v15  ;;  %v335_v15 = vld [vmem:[#allocation5 + $0x6d8] sm:$0xff] }
 0x1f6   :  { %4070 = vmatprep.subr.bf16.mxu0 %v5109_v20  ;;  %v4593_v20 = vcombine.low %v327_v10, %v331_v11  ;;  %v4601_v59 = vcombine.low %v335_v15, %v339_v17  ;;  %v363_v16 = vld [vmem:[#allocation5 + $0x7b8] sm:$0xff] }
 0x1f7   :  { %3099 = vmatpush1.bf16.msra.mxu1 %v4521_v22  ;;  %v4602_v22 = vcombine.high %v335_v15, %v339_v17  ;;  %v4625_v39 = vcombine.low %v359_v36, %v363_v16  ;;  %v423_v4 = vld [vmem:[#allocation5 + $0x998] sm:$0xff] }
 0x1f8   :  { %3100 = vmatprep.subr.bf16.mxu1 %v4530_v24  ;;  %v343_v24 = vld [vmem:[#allocation5 + $0x718] sm:$0xff] }
 0x1f9   :  { %4071 = vmatpush1.bf16.msra.mxu0 %v5107_v25  ;;  %v347_v25 = vld [vmem:[#allocation5 + $0x738] sm:$0xff] }
 0x1fa   :  { %4072 = vmatprep.subr.bf16.mxu0 %v5112_v28  ;;  %v4610_v27 = vcombine.high %v343_v24, %v347_v25  ;;  %v351_v28 = vld [vmem:[#allocation5 + $0x758] sm:$0xff] }
 0x1fb   :  { %3101 = vmatpush1.bf16.msra.mxu1 %v4529_v30  ;;  %v355_v30 = vld [vmem:[#allocation5 + $0x778] sm:$0xff] }
 0x1fc   :  { %3102 = vmatprep.subr.bf16.mxu1 %v4538_v32  ;;  %v4609_v32 = vcombine.low %v343_v24, %v347_v25  ;;  %v427_v5 = vld [vmem:[#allocation5 + $0x9b8] sm:$0xff] }
 0x1fd   :  { %4073 = vmatpush1.bf16.msra.mxu0 %v5110_v34  ;;  %v4618_v34 = vcombine.high %v351_v28, %v355_v30  ;;  %v4689_v10 = vcombine.low %v423_v4, %v427_v5  ;;  %v447_v15 = vld [vmem:[#allocation5 + $0xa58] sm:$0xff] }
 0x1fe   :  { %4074 = vmatprep.subr.bf16.mxu0 %v5115_v37  ;;  %v4617_v37 = vcombine.low %v351_v28, %v355_v30  ;;  %v451_v17 = vld [vmem:[#allocation5 + $0xa78] sm:$0xff] }
 0x1ff   :  { %3103 = vmatpush1.bf16.msra.mxu1 %v4537_v29  ;;  %v4626_v29 = vcombine.high %v359_v36, %v363_v16  ;;  %v459_v24 = vld [vmem:[#allocation5 + $0xab8] sm:$0xff]  ;;  %v4713_v25 = vcombine.low %v447_v15, %v451_v17 }
 0x200   :  { %3104 = vmatprep.subr.bf16.mxu1 %v4546_v38  ;;  %v367_v38 = vld [vmem:[#allocation5 + $0x7d8] sm:$0xff] }
 0x201   :  { %4075 = vmatpush1.bf16.msra.mxu0 %v5113_v33  ;;  %v371_v33 = vld [vmem:[#allocation5 + $0x7f8] sm:$0xff] }
 0x202   :  { %4076 = vmatprep.subr.bf16.mxu0 %v5118_v45  ;;  %v4634_v41 = vcombine.high %v367_v38, %v371_v33  ;;  %v375_v45 = vld [vmem:[#allocation5 + $0x818] sm:$0xff] }
 0x203   :  { %3105 = vmatpush1.bf16.msra.mxu1 %v4545_v46  ;;  %v379_v46 = vld [vmem:[#allocation5 + $0x838] sm:$0xff] }
 0x204   :  { %3106 = vmatprep.subr.bf16.mxu1 %v4554_v47  ;;  %v4633_v47 = vcombine.low %v367_v38, %v371_v33  ;;  %v467_v28 = vld [vmem:[#allocation5 + $0xaf8] sm:$0xff] }
 0x205   :  { %4077 = vmatpush1.bf16.msra.mxu0 %v5116_v48  ;;  %v4642_v48 = vcombine.high %v375_v45, %v379_v46  ;;  %v475_v36 = vld [vmem:[#allocation5 + $0xb38] sm:$0xff] }
 0x206   :  { %4078 = vmatprep.subr.bf16.mxu0 %v5121_v50  ;;  %v4641_v50 = vcombine.low %v375_v45, %v379_v46  ;;  %v483_v38 = vld [vmem:[#allocation5 + $0xb78] sm:$0xff] }
 0x207   :  { %3107 = vmatpush1.bf16.msra.mxu1 %v4553_v51  ;;  %v4650_v51 = vcombine.high %v383_v44, %v387_v49  ;;  %v491_v45 = vld [vmem:[#allocation5 + $0xbb8] sm:$0xff] }
 0x208   :  { %3108 = vmatprep.subr.bf16.mxu1 %v4562_v52  ;;  %v391_v52 = vld [vmem:[#allocation5 + $0x898] sm:$0xff] }
 0x209   :  { %4079 = vmatpush1.bf16.msra.mxu0 %v5119_v53  ;;  %v395_v53 = vld [vmem:[#allocation5 + $0x8b8] sm:$0xff] }
 0x20a   :  { %4080 = vmatprep.subr.bf16.mxu0 %v5124_v56  ;;  %v4658_v55 = vcombine.high %v391_v52, %v395_v53  ;;  %v399_v56 = vld [vmem:[#allocation5 + $0x8d8] sm:$0xff] }
 0x20b   :  { %3109 = vmatpush1.bf16.msra.mxu1 %v4561_v57  ;;  %v403_v57 = vld [vmem:[#allocation5 + $0x8f8] sm:$0xff] }
 0x20c   :  { %3110 = vmatprep.subr.bf16.mxu1 %v4570_v60  ;;  %v4657_v60 = vcombine.low %v391_v52, %v395_v53  ;;  %v499_v44 = vld [vmem:[#allocation5 + $0xbf8] sm:$0xff] }
 0x20d   :  { %4081 = vmatpush1.bf16.msra.mxu0 %v5122_v61  ;;  %v4666_v61 = vcombine.high %v399_v56, %v403_v57 }
 0x20e   :  { %4082 = vmatprep.subr.bf16.mxu0 %v5127_v0  ;;  %v4665_v0 = vcombine.low %v399_v56, %v403_v57 }
 0x20f   :  { %3111 = vmatpush1.bf16.msra.mxu1 %v4569_v1  ;;  %v4674_v1 = vcombine.high %v407_v62, %v411_v63 }
 0x210   :  { %3112 = vmatprep.subr.bf16.mxu1 %v4578_v2  ;;  %v415_v2 = vld [vmem:[#allocation5 + $0x958] sm:$0xff] }
 0x211   :  { %4083 = vmatpush1.bf16.msra.mxu0 %v5125_v3  ;;  %v4673_v3 = vcombine.low %v407_v62, %v411_v63  ;;  %v524_v62 = vsub.s32 2, %v5596_v31  ;;  %v536_v63 = vsub.s32 5, %v5596_v31 }
 0x212   :  { %4084 = vmatprep.subr.bf16.mxu0 %v5130_v6 }
 0x213   :  { %3113 = vmatpush1.bf16.msra.mxu1 %v4577_v7  ;;  %v4690_v7 = vcombine.high %v423_v4, %v427_v5 }
 0x214   :  { %3114 = vmatprep.subr.bf16.mxu1 %v4586_v8  ;;  %v431_v8 = vld [vmem:[#allocation5 + $0x9d8] sm:$0xff] }
 0x215   :  { %4085 = vmatpush1.bf16.msra.mxu0 %v5128_v9  ;;  %v435_v9 = vld [vmem:[#allocation5 + $0x9f8] sm:$0xff] }
 0x216   :  { %4086 = vmatprep.subr.bf16.mxu0 %v5133_v12  ;;  %v4698_v11 = vcombine.high %v431_v8, %v435_v9  ;;  %v439_v12 = vld [vmem:[#allocation5 + $0xa18] sm:$0xff] }
 0x217   :  { %3115 = vmatpush1.bf16.msra.mxu1 %v4585_v13  ;;  %v443_v13 = vld [vmem:[#allocation5 + $0xa38] sm:$0xff] }
 0x218   :  { %3116 = vmatprep.subr.bf16.mxu1 %v4594_v18  ;;  %v4697_v18 = vcombine.low %v431_v8, %v435_v9 }
 0x219   :  { %4087 = vmatpush1.bf16.msra.mxu0 %v5131_v14  ;;  %v4706_v14 = vcombine.high %v439_v12, %v443_v13 }
 0x21a   :  { %4097 = vmatprep.subr.bf16.mxu0 %v5136_v21  ;;  %v4705_v21 = vcombine.low %v439_v12, %v443_v13 }
 0x21b   :  { %3117 = vmatpush1.bf16.msra.mxu1 %v4593_v20  ;;  %v4714_v20 = vcombine.high %v447_v15, %v451_v17  ;;  %v5139_v15 = vld [vmem:[#allocation8 + $0x214] ss:$8 sps:$4 sm:$0xff]  }
 0x21c   :  { %3118 = vmatprep.subr.bf16.mxu1 %v4602_v22  ;;  %v455_v22 = vld [vmem:[#allocation5 + $0xa98] sm:$0xff] }
 0x21d   :  { %v4721_v30 = vcombine.low %v455_v22, %v459_v24 }
 0x21f   :  { %3119 = vmatpush1.bf16.msra.mxu1 %v4601_v59  ;;  %v4722_v59 = vcombine.high %v455_v22, %v459_v24  ;;  %v5145_v22 = vld [vmem:[#allocation8 + $0x234] ss:$8 sps:$4 sm:$0xff]   ;;  %v5148_v24 = vld [vmem:[#allocation8 + $0x244] ss:$8 sps:$4 sm:$0xff]  }
 0x220   :  { %3120 = vmatprep.subr.bf16.mxu1 %v4610_v27  ;;  %v463_v27 = vld [vmem:[#allocation5 + $0xad8] sm:$0xff] }
 0x221   :  { %v4729_v16 = vcombine.low %v463_v27, %v467_v28 }
 0x223   :  { %3121 = vmatpush1.bf16.msra.mxu1 %v4609_v32  ;;  %v4730_v32 = vcombine.high %v463_v27, %v467_v28  ;;  %v5149_v27 = vld [vmem:[#allocation8 + $0x250] ss:$8 sps:$4 sm:$0xff]   ;;  %v5154_v28 = vld [vmem:[#allocation8 + $0x264] ss:$8 sps:$4 sm:$0xff]  }
 0x224   :  { %3122 = vmatprep.subr.bf16.mxu1 %v4618_v34  ;;  %v471_v34 = vld [vmem:[#allocation5 + $0xb18] sm:$0xff] }
 0x225   :  { %v4737_v33 = vcombine.low %v471_v34, %v475_v36 }
 0x227   :  { %3123 = vmatpush1.bf16.msra.mxu1 %v4617_v37  ;;  %v4738_v37 = vcombine.high %v471_v34, %v475_v36  ;;  %v5155_v34 = vld [vmem:[#allocation8 + $0x270] ss:$8 sps:$4 sm:$0xff]   ;;  %v5160_v36 = vld [vmem:[#allocation8 + $0x284] ss:$8 sps:$4 sm:$0xff]  }
 0x228   :  { %3124 = vmatprep.subr.bf16.mxu1 %v4626_v29  ;;  %v479_v29 = vld [vmem:[#allocation5 + $0xb58] sm:$0xff] }
 0x229   :  { %v4745_v46 = vcombine.low %v479_v29, %v483_v38 }
 0x22b   :  { %3125 = vmatpush1.bf16.msra.mxu1 %v4625_v39  ;;  %v4746_v39 = vcombine.high %v479_v29, %v483_v38  ;;  %v5161_v29 = vld [vmem:[#allocation8 + $0x290] ss:$8 sps:$4 sm:$0xff]   ;;  %v5166_v38 = vld [vmem:[#allocation8 + $0x2a4] ss:$8 sps:$4 sm:$0xff]  }
 0x22c   :  { %3126 = vmatprep.subr.bf16.mxu1 %v4634_v41  ;;  %v487_v41 = vld [vmem:[#allocation5 + $0xb98] sm:$0xff] }
 0x22f   :  { %3127 = vmatpush1.bf16.msra.mxu1 %v4633_v47  ;;  %v4754_v47 = vcombine.high %v487_v41, %v491_v45 }
 0x230   :  { %3137 = vmatprep.subr.bf16.mxu1 %v4642_v48  ;;  %v495_v48 = vld [vmem:[#allocation5 + $0xbd8] sm:$0xff] }
 0x231   :  { %v4762_v52 = vcombine.high %v495_v48, %v499_v44 }
 0x232   :  { %3129 = vmatmul.mubr.bf16.vlgmr.msra.gmra.mrb[8].mxu1 %v5563_v35  ;;  %v419_v35 = vld [vmem:[#allocation5 + $0x978] sm:$0xff] }
 0x233   :  { %3138 = vmatpush1.bf16.msra.mxu1 %v4641_v50  ;;  %3169 = vmatprep.mubr.bf16.mxu1 %v5535_v58  ;;  %v4682_v58 = vcombine.high %v415_v2, %v419_v35  ;;  %v4681_v6 = vcombine.low %v415_v2, %v419_v35  ;;  %v4753_v50 = vcombine.low %v487_v41, %v491_v45  ;;  %v5167_v41 = vld [vmem:[#allocation8 + $0x2b0] ss:$8 sps:$4 sm:$0xff]   ;;  %v5172_v45 = vld [vmem:[#allocation8 + $0x2c4] ss:$8 sps:$4 sm:$0xff]  }
 0x234   :  { %3139 = vmatprep.subr.bf16.mxu1 %v4650_v51  ;;  %v537_v2 = vrot.slane %v5599_v42, %v536_v63 }
 0x237   :  { %3140 = vmatpush1.bf16.msra.mxu1 %v4649_v54 }
 0x238   :  { %3141 = vmatprep.subr.bf16.mxu1 %v4658_v55  ;;  %v4761_v55 = vcombine.low %v495_v48, %v499_v44  ;;  %v5175_v48 = vld [vmem:[#allocation8 + $0x2d4] ss:$8 sps:$4 sm:$0xff]   ;;  %v5173_v44 = vld [vmem:[#allocation8 + $0x2d0] ss:$8 sps:$4 sm:$0xff]  }
 0x23b   :  { %3142 = vmatpush1.bf16.msra.mxu1 %v4657_v60 }
 0x23c   :  { %3143 = vmatprep.subr.bf16.mxu1 %v4666_v61 }
 0x23f   :  { %3144 = vmatpush1.bf16.msra.mxu1 %v4665_v0  ;;  %v528_v0 = vsub.s32 3, %v5596_v31 }
 0x240   :  { %3145 = vmatprep.subr.bf16.mxu1 %v4674_v1  ;;  %v525_v1 = vrot.slane %v5599_v42, %v524_v62  ;;  %v5182_v62 = vld [vmem:[#allocation8 + $0x300] ss:$8 sps:$4 sm:$0xff]  }
 0x241   :  { %v529_v35 = vrot.slane %v5599_v42, %v528_v0  ;;  %v5187_v0 = vld [vmem:[#allocation8 + $0x314] ss:$8 sps:$4 sm:$0xff]  }
 0x243   :  { %3146 = vmatpush1.bf16.msra.mxu1 %v4673_v3 }
 0x244   :  { %3147 = vmatprep.subr.bf16.mxu1 %v4682_v58 }
 0x247   :  { %3148 = vmatpush1.bf16.msra.mxu1 %v4681_v6 }
 0x248   :  { %3149 = vmatprep.subr.bf16.mxu1 %v4690_v7 }
 0x24b   :  { %3150 = vmatpush1.bf16.msra.mxu1 %v4689_v10 }
 0x24c   :  { %3151 = vmatprep.subr.bf16.mxu1 %v4698_v11 }
 0x24f   :  { %3152 = vmatpush1.bf16.msra.mxu1 %v4697_v18  ;;  %v5134_v18 = vld [vmem:[#allocation8 + $0x200] ss:$8 sps:$4 sm:$0xff]  }
 0x250   :  { %3153 = vmatprep.subr.bf16.mxu1 %v4706_v14 }
 0x253   :  { %3154 = vmatpush1.bf16.msra.mxu1 %v4705_v21  ;;  %v5137_v21 = vld [vmem:[#allocation8 + $0x210] ss:$8 sps:$4 sm:$0xff]  }
 0x254   :  { %3155 = vmatprep.subr.bf16.mxu1 %v4714_v20  ;;  %v5142_v20 = vld [vmem:[#allocation8 + $0x224] ss:$8 sps:$4 sm:$0xff]  }
 0x257   :  { %3156 = vmatpush1.bf16.msra.mxu1 %v4713_v25  ;;  %v5146_v25 = vld [vmem:[#allocation8 + $0x240] ss:$8 sps:$4 sm:$0xff]  }
 0x258   :  { %3157 = vmatprep.subr.bf16.mxu1 %v4722_v59  ;;  %v5151_v59 = vld [vmem:[#allocation8 + $0x254] ss:$8 sps:$4 sm:$0xff]  }
 0x25b   :  { %3158 = vmatpush1.bf16.msra.mxu1 %v4721_v30  ;;  %v5152_v30 = vld [vmem:[#allocation8 + $0x260] ss:$8 sps:$4 sm:$0xff]  }
 0x25c   :  { %3159 = vmatprep.subr.bf16.mxu1 %v4730_v32  ;;  %v5157_v32 = vld [vmem:[#allocation8 + $0x274] ss:$8 sps:$4 sm:$0xff]  }
 0x25f   :  { %3160 = vmatpush1.bf16.msra.mxu1 %v4729_v16  ;;  %v5158_v16 = vld [vmem:[#allocation8 + $0x280] ss:$8 sps:$4 sm:$0xff]  }
 0x260   :  { %3161 = vmatprep.subr.bf16.mxu1 %v4738_v37  ;;  %v5163_v37 = vld [vmem:[#allocation8 + $0x294] ss:$8 sps:$4 sm:$0xff]  }
 0x263   :  { %3162 = vmatpush1.bf16.msra.mxu1 %v4737_v33  ;;  %v5164_v33 = vld [vmem:[#allocation8 + $0x2a0] ss:$8 sps:$4 sm:$0xff]  }
 0x264   :  { %3163 = vmatprep.subr.bf16.mxu1 %v4746_v39  ;;  %v5169_v39 = vld [vmem:[#allocation8 + $0x2b4] ss:$8 sps:$4 sm:$0xff]  }
 0x267   :  { %v5614_v49 = vpop.f32.mrb[8].mxu0  ;;  %3164 = vmatpush1.bf16.msra.mxu1 %v4745_v46  ;;  %v5170_v46 = vld [vmem:[#allocation8 + $0x2c0] ss:$8 sps:$4 sm:$0xff]  }
 0x268   :  { %v3050_v51 = vpop.f32.mrb[9].mxu0  ;;  %3165 = vmatprep.subr.bf16.mxu1 %v4754_v47  ;;  %v532_v47 = vsub.s32 4, %v5596_v31 }
 0x269   :  { %v3052_v53 = vpop.f32.mrb[10].mxu0  ;;  %v4963_v5 = vadd.f32 %v3050_v51, %v537_v2  ;;  %v5178_v51 = vld [vmem:[#allocation8 + $0x2e4] ss:$8 sps:$4 sm:$0xff]   ;;  %v5185_v2 = vld [vmem:[#allocation8 + $0x310] ss:$8 sps:$4 sm:$0xff]  }
 0x26a   :  { %v3053_v54 = vpop.f32.mrb[11].mxu0 }
 0x26b   :  { %3166 = vmatpush1.bf16.msra.mxu1 %v4753_v50  ;;  %v3224_v11 = vmax.f32 %v4963_v5, 0.0  ;;  %v533_v50 = vrot.slane %v5599_v42, %v532_v47  ;;  %v5181_v54 = vld [vmem:[#allocation8 + $0x2f4] ss:$8 sps:$4 sm:$0xff]   ;;  %v5230_v42 = vld [vmem:[%s5705_s5 + $0x40] sm:$0xff]  }
 0x26c   :  { %3167 = vmatprep.subr.bf16.mxu1 %v4762_v52  ;;  %v5176_v52 = vld [vmem:[#allocation8 + $0x2e0] ss:$8 sps:$4 sm:$0xff]   ;;  %v5193_v5 = vld [vmem:[#allocation8 + $0x334] ss:$8 sps:$4 sm:$0xff]  }
 0x26d   :  { %v3232_v17 = vpack.c.bf16 %v3224_v11, %v3224_v11  ;;  %v4962_v53 = vadd.f32 %v5614_v49, %v533_v50  ;;  %v5231_v49 = vld [vmem:[%s5705_s5] sm:$0xff]  }
 0x26e   :  { %v5194_v11 = vld [vmem:[#allocation8 + $0x340] ss:$8 sps:$4 sm:$0xff]  }
 0x26f   :  { %v5616_v56 = vpop.f32.mrb[12].mxu0  ;;  %3168 = vmatpush1.bf16.msra.mxu1 %v4761_v55  ;;  %v5179_v55 = vld [vmem:[#allocation8 + $0x2f0] ss:$8 sps:$4 sm:$0xff]  }
 0x270   :  { %v5618_v57 = vpop.f32.mrb[13].mxu0  ;;  %4932 = vmatprep.subr.bf16.mxu1 %v5230_v42  ;;  %v5243_v42 = vld [vmem:[%s5705_s5 + $0x30] sm:$0xff]  }
 0x271   :  { %v3216_v60 = vpop.f32.mrb[14].mxu0 }
 0x272   :  { %v3217_v61 = vpop.f32.mrb[15].mxu0  ;;  %3170 = vmatmul.mubr.bf16.vlgmr.msra.gmra.mrb[8].mxu1 %v5543_v19  ;;  %v3223_v60 = vmax.f32 %v4962_v53, 0.0 }
 0x273   :  { %v5184_v61 = vld [vmem:[#allocation8 + $0x304] ss:$8 sps:$4 sm:$0xff]   ;;  %4933 = vmatpush3.bf16.msra.mxu1 %v5231_v49  ;;  %v3363_v49 = vld [vmem:[#allocation10] sm:$0x3] }
 0x274   :  { %v3231_v63 = vpack.c.bf16 %v3223_v60, %v3223_v60 }
 0x285   :  { %v2843_v3 = vpop.f32.mrb[4].mxu1 }
 0x286   :  { %v4958_v58 = vadd.f32 %v2843_v3, %v525_v1  ;;  %v2845_v4 = vpop.f32.mrb[5].mxu1  ;;  %v5232_v1 = vld [vmem:[%s5705_s5 + $0x48] sm:$0xff]  }
 0x287   :  { %v4960_v6 = vadd.f32 %v2845_v4, %v529_v35  ;;  %v2847_v7 = vpop.f32.mrb[6].mxu1  ;;  %v5190_v35 = vld [vmem:[#allocation8 + $0x324] ss:$8 sps:$4 sm:$0xff]   ;;  %4934 = vmatprep.subr.bf16.mxu1 %v5232_v1  ;;  %v5188_v4 = vld [vmem:[#allocation8 + $0x320] ss:$8 sps:$4 sm:$0xff]   ;;  %v3368_v1 = vrot.slane %v3363_v49, %v516_v40 }
 0x288   :  { %v4959_v19 = vadd.f32 %v4958_v58, %v5592_v23  ;;  %v2848_v8 = vpop.f32.mrb[7].mxu1  ;;  %v5140_v23 = vld [vmem:[#allocation8 + $0x220] ss:$8 sps:$4 sm:$0xff]   ;;  %v5234_v58 = vld [vmem:[%s5705_s5 + $0x50] sm:$0xff]   ;;  %v5236_v7 = vld [vmem:[%s5705_s5 + $0x58] sm:$0xff]  }
 0x289   :  { %v4961_v9 = vadd.f32 %v4960_v6, %v5594_v26  ;;  %v5143_v26 = vld [vmem:[#allocation8 + $0x230] ss:$8 sps:$4 sm:$0xff]   ;;  %v5233_v3 = vld [vmem:[%s5705_s5 + $0x8] sm:$0xff]  }
 0x28a   :  { %v3221_v10 = vmax.f32 %v4959_v19, 0.0  ;;  %4935 = vmatpush3.bf16.msra.mxu1 %v5233_v3  ;;  %v5235_v6 = vld [vmem:[%s5705_s5 + $0x10] sm:$0xff]   ;;  %v5196_v8 = vld [vmem:[#allocation8 + $0x344] ss:$8 sps:$4 sm:$0xff]  }
 0x28b   :  { %v3222_v12 = vmax.f32 %v4961_v9, 0.0  ;;  %4936 = vmatprep.subr.bf16.mxu1 %v5234_v58  ;;  %v5191_v19 = vld [vmem:[#allocation8 + $0x330] ss:$8 sps:$4 sm:$0xff]  }
 0x28c   :  { %v3229_v14 = vpack.c.bf16 %v3221_v10, %v3221_v10  ;;  %v5237_v9 = vld [vmem:[%s5705_s5 + $0x18] sm:$0xff]   ;;  %v5238_v10 = vld [vmem:[%s5705_s5 + $0x60] sm:$0xff]  }
 0x28d   :  { %v3230_v13 = vpack.c.bf16 %v3222_v12, %v3222_v12  ;;  %v5199_v12 = vld [vmem:[#allocation8 + $0x354] ss:$8 sps:$4 sm:$0xff]  }
 0x28e   :  { %4937 = vmatpush3.bf16.msra.mxu1 %v5235_v6 }
 0x28f   :  { %4088 = vmatprep.mubr.bf16.mxu0 %v3230_v13  ;;  %4938 = vmatprep.subr.bf16.mxu1 %v5236_v7  ;;  %v5239_v13 = vld [vmem:[%s5705_s5 + $0x20] sm:$0xff]  }
 0x290   :  { %4089 = vmatmul.mubr.bf16.vlgmr.msra.gmra.mrb[16].mxu0 %v3229_v14  ;;  %v5197_v14 = vld [vmem:[#allocation8 + $0x350] ss:$8 sps:$4 sm:$0xff]  }
 0x291   :  { %4098 = vmatpush1.bf16.msra.mxu0 %v5134_v18  ;;  %4129 = vmatprep.mubr.bf16.mxu0 %v3232_v17  ;;  %v5240_v18 = vld [vmem:[%s5705_s5 + $0x68] sm:$0xff]  }
 0x292   :  { %4099 = vmatprep.subr.bf16.mxu0 %v5139_v15  ;;  %4939 = vmatpush3.bf16.msra.mxu1 %v5237_v9  ;;  %v5202_v15 = vld [vmem:[#allocation8 + $0x364] ss:$8 sps:$4 sm:$0xff]  }
 0x293   :  { %4940 = vmatprep.subr.bf16.mxu1 %v5238_v10  ;;  %v5241_v17 = vld [vmem:[%s5705_s5 + $0x28] sm:$0xff]  }
 0x295   :  { %4100 = vmatpush1.bf16.msra.mxu0 %v5137_v21  ;;  %v5200_v21 = vld [vmem:[#allocation8 + $0x360] ss:$8 sps:$4 sm:$0xff]  }
 0x296   :  { %4101 = vmatprep.subr.bf16.mxu0 %v5142_v20  ;;  %4941 = vmatpush3.bf16.msra.mxu1 %v5239_v13  ;;  %v5205_v20 = vld [vmem:[#allocation8 + $0x374] ss:$8 sps:$4 sm:$0xff]  }
 0x297   :  { %4942 = vmatprep.subr.bf16.mxu1 %v5240_v18 }
 0x299   :  { %4102 = vmatpush1.bf16.msra.mxu0 %v5140_v23  ;;  %v5203_v23 = vld [vmem:[#allocation8 + $0x370] ss:$8 sps:$4 sm:$0xff]  }
 0x29a   :  { %4103 = vmatprep.subr.bf16.mxu0 %v5145_v22  ;;  %4943 = vmatpush3.bf16.msra.mxu1 %v5241_v17  ;;  %v5208_v22 = vld [vmem:[#allocation8 + $0x384] ss:$8 sps:$4 sm:$0xff]  }
 0x29d   :  { %4104 = vmatpush1.bf16.msra.mxu0 %v5143_v26  ;;  %v5206_v26 = vld [vmem:[#allocation8 + $0x380] ss:$8 sps:$4 sm:$0xff]  }
 0x29e   :  { %4105 = vmatprep.subr.bf16.mxu0 %v5148_v24  ;;  %v5211_v24 = vld [vmem:[#allocation8 + $0x394] ss:$8 sps:$4 sm:$0xff]  }
 0x2a1   :  { %4106 = vmatpush1.bf16.msra.mxu0 %v5146_v25  ;;  %v5209_v25 = vld [vmem:[#allocation8 + $0x390] ss:$8 sps:$4 sm:$0xff]  }
 0x2a2   :  { %4107 = vmatprep.subr.bf16.mxu0 %v5151_v59  ;;  %v5214_v59 = vld [vmem:[#allocation8 + $0x3a4] ss:$8 sps:$4 sm:$0xff]  }
 0x2a5   :  { %4108 = vmatpush1.bf16.msra.mxu0 %v5149_v27  ;;  %v5212_v27 = vld [vmem:[#allocation8 + $0x3a0] ss:$8 sps:$4 sm:$0xff]  }
 0x2a6   :  { %4109 = vmatprep.subr.bf16.mxu0 %v5154_v28  ;;  %v5217_v28 = vld [vmem:[#allocation8 + $0x3b4] ss:$8 sps:$4 sm:$0xff]  }
 0x2a9   :  { %4110 = vmatpush1.bf16.msra.mxu0 %v5152_v30  ;;  %v5215_v30 = vld [vmem:[#allocation8 + $0x3b0] ss:$8 sps:$4 sm:$0xff]  }
 0x2aa   :  { %4111 = vmatprep.subr.bf16.mxu0 %v5157_v32  ;;  %v5220_v32 = vld [vmem:[#allocation8 + $0x3c4] ss:$8 sps:$4 sm:$0xff]  }
 0x2ad   :  { %4112 = vmatpush1.bf16.msra.mxu0 %v5155_v34  ;;  %v5218_v34 = vld [vmem:[#allocation8 + $0x3c0] ss:$8 sps:$4 sm:$0xff]  }
 0x2ae   :  { %4113 = vmatprep.subr.bf16.mxu0 %v5160_v36  ;;  %v5223_v36 = vld [vmem:[#allocation8 + $0x3d4] ss:$8 sps:$4 sm:$0xff]  }
 0x2b1   :  { %4114 = vmatpush1.bf16.msra.mxu0 %v5158_v16  ;;  %v5221_v16 = vld [vmem:[#allocation8 + $0x3d0] ss:$8 sps:$4 sm:$0xff]  }
 0x2b2   :  { %4115 = vmatprep.subr.bf16.mxu0 %v5163_v37  ;;  %v5226_v37 = vld [vmem:[#allocation8 + $0x3e4] ss:$8 sps:$4 sm:$0xff]  }
 0x2b5   :  { %4116 = vmatpush1.bf16.msra.mxu0 %v5161_v29  ;;  %v5224_v29 = vld [vmem:[#allocation8 + $0x3e0] ss:$8 sps:$4 sm:$0xff]  }
 0x2b6   :  { %4117 = vmatprep.subr.bf16.mxu0 %v5166_v38  ;;  %v5229_v38 = vld [vmem:[#allocation8 + $0x3f4] ss:$8 sps:$4 sm:$0xff]  }
 0x2b9   :  { %4118 = vmatpush1.bf16.msra.mxu0 %v5164_v33  ;;  %v5227_v33 = vld [vmem:[#allocation8 + $0x3f0] ss:$8 sps:$4 sm:$0xff]  }
 0x2ba   :  { %4119 = vmatprep.subr.bf16.mxu0 %v5169_v39  ;;  %v540_v39 = vsub.s32 6, %v5596_v31 }
 0x2bd   :  { %4120 = vmatpush1.bf16.msra.mxu0 %v5167_v41  ;;  %v544_v41 = vsub.s32 7, %v5596_v31 }
 0x2be   :  { %4121 = vmatprep.subr.bf16.mxu0 %v5172_v45  ;;  %v5246_v45 = vld [vmem:[#allocation7] sm:$0xff] }
 0x2bf   :  { %v545_v47 = vrot.slane %v5246_v45, %v544_v41 }
 0x2c1   :  { %4122 = vmatpush1.bf16.msra.mxu0 %v5170_v46  ;;  %v541_v46 = vrot.slane %v5246_v45, %v540_v39 }
 0x2c2   :  { %4123 = vmatprep.subr.bf16.mxu0 %v5175_v48 }
 0x2c5   :  { %4124 = vmatpush1.bf16.msra.mxu0 %v5173_v44 }
 0x2c6   :  { %4125 = vmatprep.subr.bf16.mxu0 %v5178_v51 }
 0x2c9   :  { %4126 = vmatpush1.bf16.msra.mxu0 %v5176_v52 }
 0x2ca   :  { %4127 = vmatprep.subr.bf16.mxu0 %v5181_v54 }
 0x2cd   :  { %4128 = vmatpush1.bf16.msra.mxu0 %v5179_v55 }
 0x2ce   :  { %4138 = vmatprep.subr.bf16.mxu0 %v5184_v61 }
 0x2d0   :  { %4130 = vmatmul.mubr.bf16.vlgmr.msra.gmra.mrb[16].mxu0 %v3231_v63 }
 0x2d1   :  { %4139 = vmatpush1.bf16.msra.mxu0 %v5182_v62 }
 0x2d2   :  { %4140 = vmatprep.subr.bf16.mxu0 %v5187_v0  ;;  %v5242_v0 = vld [vmem:[%s5705_s5 + $0x70] sm:$0xff]  }
 0x2d3   :  { %4944 = vmatprep.subr.bf16.mxu1 %v5242_v0 }
 0x2d4   :  { %4945 = vmatpush3.bf16.msra.mxu1 %v5243_v42 }
 0x2d5   :  { %4141 = vmatpush1.bf16.msra.mxu0 %v5185_v2  ;;  %v3372_v2 = vrot.slane %v3363_v49, %v520_v43 }
 0x2d6   :  { %4142 = vmatprep.subr.bf16.mxu0 %v5190_v35 }
 0x2d9   :  { %4143 = vmatpush1.bf16.msra.mxu0 %v5188_v4 }
 0x2da   :  { %4144 = vmatprep.subr.bf16.mxu0 %v5193_v5 }
 0x2dd   :  { %4145 = vmatpush1.bf16.msra.mxu0 %v5191_v19 }
 0x2de   :  { %4146 = vmatprep.subr.bf16.mxu0 %v5196_v8 }
 0x2e1   :  { %4147 = vmatpush1.bf16.msra.mxu0 %v5194_v11  ;;  %v4915_v11 = vld [vmem:[#allocation11] ss:$0 sm:$0xff] }
 0x2e2   :  { %4148 = vmatprep.subr.bf16.mxu0 %v5199_v12 }
 0x2e5   :  { %4149 = vmatpush1.bf16.msra.mxu0 %v5197_v14 }
 0x2e6   :  { %4150 = vmatprep.subr.bf16.mxu0 %v5202_v15 }
 0x2e9   :  { %4151 = vmatpush1.bf16.msra.mxu0 %v5200_v21 }
 0x2ea   :  { %4152 = vmatprep.subr.bf16.mxu0 %v5205_v20 }
 0x2ed   :  { %4153 = vmatpush1.bf16.msra.mxu0 %v5203_v23 }
 0x2ee   :  { %4154 = vmatprep.subr.bf16.mxu0 %v5208_v22 }
 0x2f1   :  { %4155 = vmatpush1.bf16.msra.mxu0 %v5206_v26 }
 0x2f2   :  { %4156 = vmatprep.subr.bf16.mxu0 %v5211_v24 }
 0x2f5   :  { %4157 = vmatpush1.bf16.msra.mxu0 %v5209_v25 }
 0x2f6   :  { %4158 = vmatprep.subr.bf16.mxu0 %v5214_v59 }
 0x2f9   :  { %4159 = vmatpush1.bf16.msra.mxu0 %v5212_v27 }
 0x2fa   :  { %4160 = vmatprep.subr.bf16.mxu0 %v5217_v28 }
 0x2fd   :  { %4161 = vmatpush1.bf16.msra.mxu0 %v5215_v30 }
 0x2fe   :  { %4162 = vmatprep.subr.bf16.mxu0 %v5220_v32 }
 0x301   :  { %4163 = vmatpush1.bf16.msra.mxu0 %v5218_v34 }
 0x302   :  { %4164 = vmatprep.subr.bf16.mxu0 %v5223_v36 }
 0x305   :  { %4165 = vmatpush1.bf16.msra.mxu0 %v5221_v16 }
 0x306   :  { %4166 = vmatprep.subr.bf16.mxu0 %v5226_v37 }
 0x309   :  { %4167 = vmatpush1.bf16.msra.mxu0 %v5224_v29 }
 0x30a   :  { %4168 = vmatprep.subr.bf16.mxu0 %v5229_v38 }
 0x30d   :  { %4169 = vmatpush1.bf16.msra.mxu0 %v5227_v33 }
 0x345   :  { %v3171_v48 = vpop.f32.mrb[8].mxu1 }
 0x346   :  { %v4964_v44 = vadd.f32 %v3171_v48, %v541_v46  ;;  %v3173_v50 = vpop.f32.mrb[9].mxu1 }
 0x347   :  { %v4966_v51 = vadd.f32 %v3173_v50, %v545_v47  ;;  %v3175_v52 = vpop.f32.mrb[10].mxu1 }
 0x348   :  { %v4965_v53 = vadd.f32 %v4964_v44, %v5616_v56  ;;  %v3176_v54 = vpop.f32.mrb[11].mxu1  ;;  %v5244_v56 = vld [vmem:[%s5705_s5 + $0x78] sm:$0xff]  }
 0x349   :  { %v4967_v55 = vadd.f32 %v4966_v51, %v5618_v57  ;;  %v5245_v57 = vld [vmem:[%s5705_s5 + $0x38] sm:$0xff]   ;;  %4946 = vmatprep.subr.bf16.mxu1 %v5244_v56  ;;  %s5422_s5 = smov [#allocation13]  }
 0x34a   :  { %v3225_v60 = vmax.f32 %v4965_v53, 0.0  ;;  %4947 = vmatpush3.bf16.msra.mxu1 %v5245_v57  ;;  %s4367_s25 = sshll.u32 %s5422_s5, 4  ;;  %s4368_s25 = int_to_ptr.vmem [resolvable:$true] %s4367_s25 }
 0x34b   :  { %v3226_v61 = vmax.f32 %v4967_v55, 0.0  ;;  %s5379_s26 = scalar_lea.vmem %s4368_s25, 128  ;;  %p5384_p7 = scmp.lt.s32.totalorder %s4368_s25, %s4368_s25 }
 0x34c   :  { %v3233_v63 = vpack.c.bf16 %v3225_v60, %v3225_v60  ;;  %p5380_p6 = scmp.ne.s32.totalorder %s4368_s25, %s5379_s26  ;;  %p5385_p8 = scmp.lt.s32.totalorder %s5379_s26, %s5379_s26 }
 0x34d   :  { %v3234_v62 = vpack.c.bf16 %v3226_v61, %v3226_v61 }
 0x34e   :  { %p5386_p9 = por %p5385_p8, %p5384_p7 }
 0x34f   :  { %4170 = vmatprep.mubr.bf16.mxu0 %v3234_v62 }
 0x350   :  { %4171 = vmatmul.mubr.bf16.vlgmr.msra.gmra.mrb[16].mxu0 %v3233_v63  ;;  %p5387_p10 = pnand %p5386_p9, %p5380_p6 }
 0x423   :  { %v4172_v35 = vpop.f32.mrb[16].mxu0 }
 0x424   :  { %v4968_v3 = vadd.f32 %v4172_v35, %v3368_v1  ;;  %v4174_v58 = vpop.f32.mrb[17].mxu0 }
 0x425   :  { %v4969_v4 = vadd.f32 %v4174_v58, %v3372_v2  ;;  %v4176_v5 = vpop.f32.mrb[18].mxu0 }
 0x426   :  { %v4179_v6 = vmax.f32 %v4968_v3, 0.0  ;;  %v4177_v7 = vpop.f32.mrb[19].mxu0 }
 0x427   :  { %v4180_v19 = vmax.f32 %v4969_v4, 0.0 }
 0x428   :  { %v4181_v9 = vpack.c.bf16 %v4179_v6, %v4179_v6 }
 0x429   :  { %v4182_v8 = vpack.c.bf16 %v4180_v19, %v4180_v19 }
 0x42b   :  { %4350 = vmatprep.mubr.bf16.mxu1 %v4182_v8 }
 0x42c   :  { %4351 = vmatmul.mubr.bf16.vlgmr.msra.gmra.mrb[12].mxu1 %v4181_v9 }
 0x4ff   :  { %v4948_v10 = vpop.f32.mrb[12].mxu1 }
 0x500   :  { %v4949_v12 = vpop.f32.mrb[13].mxu1 }
 0x501   :  { %v4950_v13 = vadd.f32 %v4949_v12, %v4948_v10  ;;  %v4951_v40 = vpop.f32.mrb[14].mxu1 }
 0x502   :  { %v4952_v18 = vpop.f32.mrb[15].mxu1 }
 0x503   :  { %v4353_v31 = vadd.f32 %v4950_v13, %v4915_v11 }
 0x505   :  { %v4358_v43 = vmax.f32 %v4353_v31, 0.0 }
 0x507   :  { %4360 = vst.msk [vmem:[#allocation13] sm:$0xff] %vm4359_vm2, %v4358_v43 }
 0x508   :  { %5390 = shalt.err (!%p5387_p10)
}
 0x509   :  { %s5391_s29 = scalar_lea.hbm %s5707_s7, 128 }
 0x50a   :  { %p5392_p11 = scmp.ne.s32.totalorder %s5707_s7, %s5391_s29  ;;  %p5395_p12 = scmp.lt.u32.totalorder %s5391_s29, %s5707_s7 }
 0x50c   :  { %p5397_p13 = pnand %p5395_p12, %p5392_p11 }
 0x50e   :  { %5400 = shalt.err (!%p5397_p13)
}
 0x50f   :  { %4370 = dma.vmem_to_hbm [thread:$0]  %s4368_s25, 128, %s5707_s7, [#allocation4]  }
 0x510   :  { %5409 = dma.done.wait [#allocation4], 128  }
 0x511   :  { %5410 = vsyncadd [#allocation4], 4294967168 }
 0x512   :  { %4374 = vsyncpa [#allocation3], 1 }
 0x513   :  { %4375 = vsyncpa [#allocation6], 1 }
 0x514   :  { %4376 = vsyncpa [#allocation9], 1 }
 0x515   :  { %4377 = vsyncpa [#allocation12], 1 }
 0x516   :  { %4378 = vsyncpa [#allocation4], 1 }

</bundles_post_ra>
